<compile_context>
chip_gen: v7x
topology: tpu7x:2x2x1
jax: 0.10.0
libtpu: 0.0.40
codegen_flags: <defaults>
</compile_context>

<pallas_src>
import functools

import jax
import jax.numpy as jnp
from jax.experimental import pallas as pl
from jax.experimental.pallas import tpu as pltpu


# ----------------------------------------------------------------------------- helpers

def _layernorm(v, g, b, eps=1e-5):
    mu = jnp.mean(v, axis=-1, keepdims=True)
    var = jnp.mean((v - mu) ** 2, axis=-1, keepdims=True)
    return (v - mu) * jax.lax.rsqrt(var + eps) * g + b


def _mm(a, w):
    # bf16 x bf16 MXU matmul, f32 accumulation (operands are already bf16).
    return jnp.dot(a, w, preferred_element_type=jnp.float32)


def _mm_nt(a, b):
    # a (m, k) @ b (n, k)^T -> (m, n), bf16 in / f32 accumulate.
    return jax.lax.dot_general(a, b, (((1,), (1,)), ((), ())),
                               preferred_element_type=jnp.float32)


# ----------------------------------------------------------------------------- kernel

def _clip_fused_kernel(
    # -------- inputs --------
    tok_ref,                          # (1, TB*S_pad, CPP)  patch rows (row 0 / pad rows = 0)
    cls_pos_ref,                      # (TB*S_pad, D)       CLS+pos table, tiled over batch tile
    pre_g_ref, pre_b_ref,             # (1, D)              CLIP pre_layrnorm
    patch_w_ref,                      # (CPP, D) bf16       conv-as-matmul (bias-free in CLIP)
    ln1_g_ref, ln1_b_ref,             # (1, 1, D)           per-layer blocks below
    wqkv_ref, bqkv_ref,               # (1, D, 3D) bf16 / (1, 1, 3D) f32 (q-scale folded in)
    wo_ref, bo_ref,                   # (1, D, D)  bf16 / (1, 1, D)
    ln2_g_ref, ln2_b_ref,             # (1, 1, D)
    wfc1_ref, bfc1_ref,               # (1, D, F)  bf16 / (1, 1, F)
    wfc2_ref, bfc2_ref,               # (1, F, D)  bf16 / (1, 1, D)
    post_g_ref, post_b_ref,           # (1, D)              post LayerNorm on CLS
    proj_w_ref,                       # (D, Pd) bf16        visual projection (no bias)
    hw1_ref, hb1_ref,                 # (Pd, Hh) bf16 / (1, Hh)   MLP head
    hw2_ref, hb2_ref,                 # (Hh, C)  bf16 / (1, C)
    # -------- outputs --------
    out_ref,                          # (1, TB, C)
    # -------- scratch --------
    x_sc,                             # VMEM (TB*S_pad, D) f32 : resident activations
    attn_sc,                          # VMEM (TB*S_pad, D) f32 : head-concat attention out
    cls_sc,                           # VMEM (TB, D)       f32 : gathered CLS rows (tail)
    *, num_heads, seq_len):

    l = pl.program_id(1)
    ts_pad, d = x_sc.shape
    tb = cls_sc.shape[0]
    s_pad = ts_pad // tb
    dh = d // num_heads
    bf16 = jnp.bfloat16

    # ---- first layer step: patch embed + (CLS+pos) table + pre-LN, one full-tile store
    @pl.when(l == 0)
    def _init():
        emb = _mm(tok_ref[0].astype(bf16), patch_w_ref[...])       # zero rows stay zero
        x0 = emb + cls_pos_ref[...]                                # CLS emb folded into row 0
        x_sc[...] = _layernorm(x0, pre_g_ref[...], pre_b_ref[...])

    # ---- one CLIP pre-LN transformer block (layer selected by the BlockSpec index_map)
    x = x_sc[...]                                                  # (TB*S_pad, D) f32

    h = _layernorm(x, ln1_g_ref[0], ln1_b_ref[0]).astype(bf16)     # hoisted cast
    qkv = _mm(h, wqkv_ref[0]) + bqkv_ref[0]                        # fused QKV, full-width MXU
    qkv = qkv.astype(bf16)                                         # (1/sqrt(Dh) already in wq)

    # Per-image, per-head attention (scores / PV are inherently per-head).  Head outputs
    # are written head-concatenated into attn_sc so the out-projection is ONE K=D matmul.
    # Padded query rows are computed (aligned 8-row blocks) but never read as keys.
    # TODO(synk): at real CLIP head counts / batch tiles replace this unrolled Python loop
    #             with a lax.fori_loop (or head-batched einsum) to bound code size / vregs.
    for b in range(tb):
        r = b * s_pad
        for hd in range(num_heads):
            c = hd * dh
            q = qkv[r:r + s_pad, c:c + dh]                         # (S_pad, Dh)
            k = qkv[r:r + seq_len, d + c:d + c + dh]               # (S, Dh) real tokens only
            v = qkv[r:r + seq_len, 2 * d + c:2 * d + c + dh]
            sc = _mm_nt(q, k)                                      # (S_pad, S) f32
            sc = sc - jnp.max(sc, axis=-1, keepdims=True)
            p = jnp.exp(sc)
            p = p * pl.reciprocal(jnp.sum(p, axis=-1, keepdims=True), approx=True)
            attn_sc[r:r + s_pad, c:c + dh] = _mm(p.astype(bf16), v)

    attn = _mm(attn_sc[...].astype(bf16), wo_ref[0]) + bo_ref[0]   # fused out-proj (K=D)
    x = x + attn

    h2 = _layernorm(x, ln2_g_ref[0], ln2_b_ref[0]).astype(bf16)
    f = _mm(h2, wfc1_ref[0]) + bfc1_ref[0]
    f = f * jax.nn.sigmoid(1.702 * f)                              # quick-GELU (CLIP)
    x = x + _mm(f.astype(bf16), wfc2_ref[0]) + bfc2_ref[0]
    x_sc[...] = x

    # ---- tail (fused): post-LN on CLS tokens + visual projection + MLP head ----
    @pl.when(l == pl.num_programs(1) - 1)
    def _tail():
        for b in range(tb):                                        # gather CLS rows (aligned)
            cls_sc[b:b + 1, :] = x[b * s_pad:b * s_pad + 1, :]
        cls = _layernorm(cls_sc[...], post_g_ref[...], post_b_ref[...]).astype(bf16)
        feat = _mm(cls, proj_w_ref[...])                           # CLIP image features (TB,Pd)
        hh = jnp.maximum(_mm(feat.astype(bf16), hw1_ref[...]) + hb1_ref[...], 0.0)
        out = _mm(hh.astype(bf16), hw2_ref[...]) + hb2_ref[...]
        out_ref[0] = out.astype(out_ref.dtype)                     # one (TB, C) slab store


# ----------------------------------------------------------------------------- wrapper

_PRE_NAMES = ["pre_ln_g", "pre_ln_b", "patch_w"]
_LAYER_NAMES = ["ln1_g", "ln1_b", "wqkv", "bqkv", "wo", "bo",
                "ln2_g", "ln2_b", "wfc1", "bfc1", "wfc2", "bfc2"]
_TAIL_NAMES = ["post_ln_g", "post_ln_b", "proj_w",
               "head_w1", "head_b1", "head_w2", "head_b2"]


def clip_with_mlp_forward(image, params, *, patch=8, num_heads=2, batch_tile=None):
    # image: NCHW float32 (PyTorch pixel_values convention).
    B, C_in, H, W = image.shape
    gh, gw = H // patch, W // patch
    P = gh * gw
    S = P + 1
    S_pad = -(-S // 8) * 8                       # per-image token block, sublane-aligned
    CPP = C_in * patch * patch

    TB = B if batch_tile is None else batch_tile
    assert B % TB == 0, "batch must be divisible by the batch tile"
    NB = B // TB

    D = params["patch_w"].shape[1]
    L = params["wqkv"].shape[0]
    n_classes = params["head_b2"].shape[-1]

    # Patch extraction (strided conv == unfold) + zero CLS-slot/pad rows — plain-JAX glue.
    patches = image.reshape(B, C_in, gh, patch, gw, patch)
    patches = patches.transpose(0, 2, 4, 1, 3, 5).reshape(B, P, CPP)
    tok = jnp.zeros((B, S_pad, CPP), patches.dtype).at[:, 1:S, :].set(patches)
    tok = tok.reshape(NB, TB * S_pad, CPP)
    cls_pos = jnp.zeros((S_pad, D), jnp.float32).at[:S, :].set(params["cls_pos"])
    cls_pos = jnp.tile(cls_pos, (TB, 1))                           # (TB*S_pad, D)

    def spec_const(a):
        return pl.BlockSpec(a.shape, lambda b, l: (0,) * a.ndim)

    def spec_layer(a):
        return pl.BlockSpec((1,) + a.shape[1:], lambda b, l: (l, 0, 0))

    in_specs = (
        [pl.BlockSpec((1, TB * S_pad, CPP), lambda b, l: (b, 0, 0)),
         spec_const(cls_pos)]
        + [spec_const(params[n]) for n in _PRE_NAMES]
        + [spec_layer(params[n]) for n in _LAYER_NAMES]
        + [spec_const(params[n]) for n in _TAIL_NAMES]
    )
    in_arrays = ([tok, cls_pos]
                 + [params[n] for n in _PRE_NAMES]
                 + [params[n] for n in _LAYER_NAMES]
                 + [params[n] for n in _TAIL_NAMES])

    out = pl.pallas_call(
        functools.partial(_clip_fused_kernel, num_heads=num_heads, seq_len=S),
        out_shape=jax.ShapeDtypeStruct((NB, TB, n_classes), jnp.float32),
        grid_spec=pltpu.PrefetchScalarGridSpec(
            num_scalar_prefetch=0,
            grid=(NB, L),                         # (parallel batch tiles, sequential layers)
            in_specs=in_specs,
            out_specs=pl.BlockSpec((1, TB, n_classes), lambda b, l: (b, 0, 0)),
            scratch_shapes=[pltpu.VMEM((TB * S_pad, D), jnp.float32),
                            pltpu.VMEM((TB * S_pad, D), jnp.float32),
                            pltpu.VMEM((TB, D), jnp.float32)],
        ),
        compiler_params=pltpu.CompilerParams(
            # NOTE(v7x): with ("parallel", ...) each TensorCore streams its own copy of the
            # layer weights; keep per-chip batch >= 2*TB (or shard heads/FFN halves across
            # cores) so the shared HBM bandwidth is not spent twice.
            dimension_semantics=("parallel", "arbitrary"),
            # Raise the scoped-VMEM limit above the 16/32 MiB defaults so whole-layer weight
            # double-buffering is possible at real CLIP sizes; kept < 64 MiB for v7x.
            vmem_limit_bytes=48 * 1024 * 1024),
    )(*in_arrays)
    return out.reshape(B, n_classes)


# ----------------------------------------------------------------------------- params

def init_params(key, *, in_chans=4, patch=8, img=16, d_model=32, n_heads=2,
                n_layers=2, mlp_ratio=4, proj_dim=16, head_hidden=32, n_classes=4):
    """Synthetic, deterministically-initialized CLIP+MLP weights, packed for the kernel:
       - matmul weights pre-cast to bf16 (halves HBM weight traffic); LN params / biases f32
       - q/k/v fused into wqkv (L, D, 3D); out-proj kept as one (L, D, D) matrix
       - CLIP's 1/sqrt(Dh) attention scale folded into the q columns of wqkv / bqkv
       - CLS embedding folded into row 0 of the (S, D) cls_pos table
    """
    num_patches = (img // patch) ** 2
    S = num_patches + 1
    Dh = d_model // n_heads
    F = mlp_ratio * d_model
    scale = 1.0 / (Dh ** 0.5)
    bf16 = jnp.bfloat16
    keys = iter(jax.random.split(key, 24))

    def nrm(shape, s=0.02):
        return (s * jax.random.normal(next(keys), shape)).astype(jnp.float32)

    # torch-layout raw weights (f32), then packed for the kernel.
    wq = nrm((n_layers, d_model, d_model)) * scale
    bq = nrm((n_layers, 1, d_model)) * scale
    wk = nrm((n_layers, d_model, d_model))
    bk = nrm((n_layers, 1, d_model))
    wv = nrm((n_layers, d_model, d_model))
    bv = nrm((n_layers, 1, d_model))
    cls = nrm((1, d_model))
    pos = nrm((S, d_model))
    cls_pos = pos.at[0:1, :].add(cls)

    return {
        # embeddings (CLIP conv patch-embed has no bias)
        "patch_w": nrm((in_chans * patch * patch, d_model)).astype(bf16),
        "cls_pos": cls_pos,                                          # (S, D) f32
        "pre_ln_g": jnp.ones((1, d_model), jnp.float32),
        "pre_ln_b": jnp.zeros((1, d_model), jnp.float32),
        # stacked per-layer encoder weights (fused QKV / fused out-proj)
        "ln1_g": jnp.ones((n_layers, 1, d_model), jnp.float32),
        "ln1_b": jnp.zeros((n_layers, 1, d_model), jnp.float32),
        "wqkv": jnp.concatenate([wq, wk, wv], axis=-1).astype(bf16),  # (L, D, 3D)
        "bqkv": jnp.concatenate([bq, bk, bv], axis=-1),               # (L, 1, 3D) f32
        "wo": nrm((n_layers, d_model, d_model)).astype(bf16),
        "bo": nrm((n_layers, 1, d_model)),
        "ln2_g": jnp.ones((n_layers, 1, d_model), jnp.float32),
        "ln2_b": jnp.zeros((n_layers, 1, d_model), jnp.float32),
        "wfc1": nrm((n_layers, d_model, F)).astype(bf16),
        "bfc1": nrm((n_layers, 1, F)),
        "wfc2": nrm((n_layers, F, d_model)).astype(bf16),
        "bfc2": nrm((n_layers, 1, d_model)),
        # CLIP tail + MLP head
        "post_ln_g": jnp.ones((1, d_model), jnp.float32),
        "post_ln_b": jnp.zeros((1, d_model), jnp.float32),
        "proj_w": nrm((d_model, proj_dim)).astype(bf16),
        "head_w1": nrm((proj_dim, head_hidden)).astype(bf16),
        "head_b1": nrm((1, head_hidden)),
        "head_w2": nrm((head_hidden, n_classes)).astype(bf16),
        "head_b2": nrm((1, n_classes)),
    }


if __name__ == "__main__":
    key = jax.random.PRNGKey(0)
    k_img, k_par = jax.random.split(key)

    image = jax.random.normal(k_img, (2, 4, 16, 16), jnp.float32)   # (B, C, H, W)
    params = init_params(k_par)

    fwd = jax.jit(functools.partial(clip_with_mlp_forward,
                                    patch=8, num_heads=2, batch_tile=2))
    out = jax.block_until_ready(fwd(image, params))
    assert out.shape == (2, 4) and out.dtype == jnp.float32
    assert bool(jnp.all(jnp.isfinite(out)))
    print("KERNEL_OK")
</pallas_src>

<mosaic_0001>
module attributes {stable_mosaic.version = 11 : i64} {
  func.func @_clip_fused_kernel(%arg0: i32, %arg1: i32, %arg2: memref<1x16x256xf32, #tpu.memory_space<vmem>>, %arg3: memref<16x32xf32, #tpu.memory_space<vmem>>, %arg4: memref<1x32xf32, #tpu.memory_space<vmem>>, %arg5: memref<1x32xf32, #tpu.memory_space<vmem>>, %arg6: memref<256x32xbf16, #tpu.memory_space<vmem>>, %arg7: memref<1x1x32xf32, #tpu.memory_space<vmem>>, %arg8: memref<1x1x32xf32, #tpu.memory_space<vmem>>, %arg9: memref<1x32x96xbf16, #tpu.memory_space<vmem>>, %arg10: memref<1x1x96xf32, #tpu.memory_space<vmem>>, %arg11: memref<1x32x32xbf16, #tpu.memory_space<vmem>>, %arg12: memref<1x1x32xf32, #tpu.memory_space<vmem>>, %arg13: memref<1x1x32xf32, #tpu.memory_space<vmem>>, %arg14: memref<1x1x32xf32, #tpu.memory_space<vmem>>, %arg15: memref<1x32x128xbf16, #tpu.memory_space<vmem>>, %arg16: memref<1x1x128xf32, #tpu.memory_space<vmem>>, %arg17: memref<1x128x32xbf16, #tpu.memory_space<vmem>>, %arg18: memref<1x1x32xf32, #tpu.memory_space<vmem>>, %arg19: memref<1x32xf32, #tpu.memory_space<vmem>>, %arg20: memref<1x32xf32, #tpu.memory_space<vmem>>, %arg21: memref<32x16xbf16, #tpu.memory_space<vmem>>, %arg22: memref<16x32xbf16, #tpu.memory_space<vmem>>, %arg23: memref<1x32xf32, #tpu.memory_space<vmem>>, %arg24: memref<32x4xbf16, #tpu.memory_space<vmem>>, %arg25: memref<1x4xf32, #tpu.memory_space<vmem>>, %arg26: memref<1x2x4xf32, #tpu.memory_space<vmem>>, %arg27: memref<16x32xf32, #tpu.memory_space<vmem>>, %arg28: memref<16x32xf32, #tpu.memory_space<vmem>>, %arg29: memref<2x32xf32, #tpu.memory_space<vmem>>) attributes {dimension_semantics = [#tpu.dimension_semantics<parallel>, #tpu.dimension_semantics<arbitrary>], iteration_bounds = array<i64: 1, 2>, scalar_prefetch = 0 : i64, scratch_operands = 3 : i64, tpu.core_type = #tpu.core_type<tc>, window_params = [{transform_indices = @transform_0, window_bounds = array<i64: 1, 16, 256>}, {pipeline_mode = #tpu.pipeline_mode<synchronous>, transform_indices = @transform_1, window_bounds = array<i64: 16, 32>}, {pipeline_mode = #tpu.pipeline_mode<synchronous>, transform_indices = @transform_2, window_bounds = array<i64: 1, 32>}, {pipeline_mode = #tpu.pipeline_mode<synchronous>, transform_indices = @transform_3, window_bounds = array<i64: 1, 32>}, {pipeline_mode = #tpu.pipeline_mode<synchronous>, transform_indices = @transform_4, window_bounds = array<i64: 256, 32>}, {transform_indices = @transform_5, window_bounds = array<i64: 1, 1, 32>}, {transform_indices = @transform_6, window_bounds = array<i64: 1, 1, 32>}, {transform_indices = @transform_7, window_bounds = array<i64: 1, 32, 96>}, {transform_indices = @transform_8, window_bounds = array<i64: 1, 1, 96>}, {transform_indices = @transform_9, window_bounds = array<i64: 1, 32, 32>}, {transform_indices = @transform_10, window_bounds = array<i64: 1, 1, 32>}, {transform_indices = @transform_11, window_bounds = array<i64: 1, 1, 32>}, {transform_indices = @transform_12, window_bounds = array<i64: 1, 1, 32>}, {transform_indices = @transform_13, window_bounds = array<i64: 1, 32, 128>}, {transform_indices = @transform_14, window_bounds = array<i64: 1, 1, 128>}, {transform_indices = @transform_15, window_bounds = array<i64: 1, 128, 32>}, {transform_indices = @transform_16, window_bounds = array<i64: 1, 1, 32>}, {pipeline_mode = #tpu.pipeline_mode<synchronous>, transform_indices = @transform_17, window_bounds = array<i64: 1, 32>}, {pipeline_mode = #tpu.pipeline_mode<synchronous>, transform_indices = @transform_18, window_bounds = array<i64: 1, 32>}, {pipeline_mode = #tpu.pipeline_mode<synchronous>, transform_indices = @transform_19, window_bounds = array<i64: 32, 16>}, {pipeline_mode = #tpu.pipeline_mode<synchronous>, transform_indices = @transform_20, window_bounds = array<i64: 16, 32>}, {pipeline_mode = #tpu.pipeline_mode<synchronous>, transform_indices = @transform_21, window_bounds = array<i64: 1, 32>}, {pipeline_mode = #tpu.pipeline_mode<synchronous>, transform_indices = @transform_22, window_bounds = array<i64: 32, 4>}, {pipeline_mode = #tpu.pipeline_mode<synchronous>, transform_indices = @transform_23, window_bounds = array<i64: 1, 4>}, {transform_indices = @transform_24, window_bounds = array<i64: 1, 2, 4>}]} {
    %c0_i32 = arith.constant 0 : i32
    %0 = arith.cmpi eq, %arg1, %c0_i32 : i32
    %1 = arith.extui %0 : i1 to i32
    %c0_i32_0 = arith.constant 0 : i32
    %2 = arith.cmpi ne, %1, %c0_i32_0 : i32
    scf.if %2 {
      %c0_80 = arith.constant 0 : index
      %c0_81 = arith.constant 0 : index
      %c0_82 = arith.constant 0 : index
      %172 = vector.load %arg2[%c0_80, %c0_81, %c0_82] : memref<1x16x256xf32, #tpu.memory_space<vmem>>, vector<1x16x256xf32>
      %173 = vector.shape_cast %172 : vector<1x16x256xf32> to vector<16x256xf32>
      %174 = arith.truncf %173 : vector<16x256xf32> to vector<16x256xbf16>
      %c0_83 = arith.constant 0 : index
      %c0_84 = arith.constant 0 : index
      %175 = vector.load %arg6[%c0_83, %c0_84] : memref<256x32xbf16, #tpu.memory_space<vmem>>, vector<256x32xbf16>
      %cst_85 = arith.constant dense<0.000000e+00> : vector<16x32xf32>
      %176 = tpu.matmul %174, %175, %cst_85 {dimension_numbers = #tpu.dot_dimension_numbers<[1], [0], [0], [1], [0, 0, 1, 1], [], []>} : vector<16x256xbf16>, vector<256x32xbf16>, vector<16x32xf32> -> vector<16x32xf32>
      %c0_86 = arith.constant 0 : index
      %c0_87 = arith.constant 0 : index
      %177 = vector.load %arg3[%c0_86, %c0_87] : memref<16x32xf32, #tpu.memory_space<vmem>>, vector<16x32xf32>
      %178 = arith.addf %176, %177 : vector<16x32xf32>
      %c0_88 = arith.constant 0 : index
      %c0_89 = arith.constant 0 : index
      %179 = vector.load %arg4[%c0_88, %c0_89] : memref<1x32xf32, #tpu.memory_space<vmem>>, vector<1x32xf32>
      %c0_90 = arith.constant 0 : index
      %c0_91 = arith.constant 0 : index
      %180 = vector.load %arg5[%c0_90, %c0_91] : memref<1x32xf32, #tpu.memory_space<vmem>>, vector<1x32xf32>
      %cst_92 = arith.constant dense<0.000000e+00> : vector<16xf32>
      %181 = vector.multi_reduction <add>, %178, %cst_92 [1] : vector<16x32xf32> to vector<16xf32>
      %182 = vector.shape_cast %181 : vector<16xf32> to vector<16x1xf32>
      %cst_93 = arith.constant 3.200000e+01 : f32
      %183 = vector.broadcast %cst_93 : f32 to vector<16x1xf32>
      %184 = arith.divf %182, %183 : vector<16x1xf32>
      %185 = vector.broadcast %184 : vector<16x1xf32> to vector<16x32xf32>
      %186 = arith.subf %178, %185 : vector<16x32xf32>
      %187 = arith.mulf %186, %186 : vector<16x32xf32>
      %cst_94 = arith.constant dense<0.000000e+00> : vector<16xf32>
      %188 = vector.multi_reduction <add>, %187, %cst_94 [1] : vector<16x32xf32> to vector<16xf32>
      %189 = vector.shape_cast %188 : vector<16xf32> to vector<16x1xf32>
      %cst_95 = arith.constant 3.200000e+01 : f32
      %190 = vector.broadcast %cst_95 : f32 to vector<16x1xf32>
      %191 = arith.divf %189, %190 : vector<16x1xf32>
      %192 = vector.broadcast %184 : vector<16x1xf32> to vector<16x32xf32>
      %193 = arith.subf %178, %192 : vector<16x32xf32>
      %cst_96 = arith.constant 9.99999974E-6 : f32
      %194 = vector.broadcast %cst_96 : f32 to vector<16x1xf32>
      %195 = arith.addf %191, %194 : vector<16x1xf32>
      %196 = math.rsqrt %195 : vector<16x1xf32>
      %197 = vector.broadcast %196 : vector<16x1xf32> to vector<16x32xf32>
      %198 = arith.mulf %193, %197 : vector<16x32xf32>
      %199 = vector.broadcast %179 : vector<1x32xf32> to vector<16x32xf32>
      %200 = arith.mulf %198, %199 : vector<16x32xf32>
      %201 = vector.broadcast %180 : vector<1x32xf32> to vector<16x32xf32>
      %202 = arith.addf %200, %201 : vector<16x32xf32>
      %c0_97 = arith.constant 0 : index
      %c0_98 = arith.constant 0 : index
      %203 = vector.load %arg27[%c0_97, %c0_98] : memref<16x32xf32, #tpu.memory_space<vmem>>, vector<16x32xf32>
      tpu.vector_store %arg27[%c0_97, %c0_98], %202 {strides = array<i32>} : memref<16x32xf32, #tpu.memory_space<vmem>>, vector<16x32xf32>,
    } else {
    }
    %c0 = arith.constant 0 : index
    %c0_1 = arith.constant 0 : index
    %3 = vector.load %arg27[%c0, %c0_1] : memref<16x32xf32, #tpu.memory_space<vmem>>, vector<16x32xf32>
    %c0_2 = arith.constant 0 : index
    %c0_3 = arith.constant 0 : index
    %c0_4 = arith.constant 0 : index
    %4 = vector.load %arg7[%c0_2, %c0_3, %c0_4] : memref<1x1x32xf32, #tpu.memory_space<vmem>>, vector<1x1x32xf32>
    %5 = vector.shape_cast %4 : vector<1x1x32xf32> to vector<1x32xf32>
    %c0_5 = arith.constant 0 : index
    %c0_6 = arith.constant 0 : index
    %c0_7 = arith.constant 0 : index
    %6 = vector.load %arg8[%c0_5, %c0_6, %c0_7] : memref<1x1x32xf32, #tpu.memory_space<vmem>>, vector<1x1x32xf32>
    %7 = vector.shape_cast %6 : vector<1x1x32xf32> to vector<1x32xf32>
    %cst = arith.constant dense<0.000000e+00> : vector<16xf32>
    %8 = vector.multi_reduction <add>, %3, %cst [1] : vector<16x32xf32> to vector<16xf32>
    %9 = vector.shape_cast %8 : vector<16xf32> to vector<16x1xf32>
    %cst_8 = arith.constant 3.200000e+01 : f32
    %10 = vector.broadcast %cst_8 : f32 to vector<16x1xf32>
    %11 = arith.divf %9, %10 : vector<16x1xf32>
    %12 = vector.broadcast %11 : vector<16x1xf32> to vector<16x32xf32>
    %13 = arith.subf %3, %12 : vector<16x32xf32>
    %14 = arith.mulf %13, %13 : vector<16x32xf32>
    %cst_9 = arith.constant dense<0.000000e+00> : vector<16xf32>
    %15 = vector.multi_reduction <add>, %14, %cst_9 [1] : vector<16x32xf32> to vector<16xf32>
    %16 = vector.shape_cast %15 : vector<16xf32> to vector<16x1xf32>
    %cst_10 = arith.constant 3.200000e+01 : f32
    %17 = vector.broadcast %cst_10 : f32 to vector<16x1xf32>
    %18 = arith.divf %16, %17 : vector<16x1xf32>
    %19 = vector.broadcast %11 : vector<16x1xf32> to vector<16x32xf32>
    %20 = arith.subf %3, %19 : vector<16x32xf32>
    %cst_11 = arith.constant 9.99999974E-6 : f32
    %21 = vector.broadcast %cst_11 : f32 to vector<16x1xf32>
    %22 = arith.addf %18, %21 : vector<16x1xf32>
    %23 = math.rsqrt %22 : vector<16x1xf32>
    %24 = vector.broadcast %23 : vector<16x1xf32> to vector<16x32xf32>
    %25 = arith.mulf %20, %24 : vector<16x32xf32>
    %26 = vector.broadcast %5 : vector<1x32xf32> to vector<16x32xf32>
    %27 = arith.mulf %25, %26 : vector<16x32xf32>
    %28 = vector.broadcast %7 : vector<1x32xf32> to vector<16x32xf32>
    %29 = arith.addf %27, %28 : vector<16x32xf32>
    %30 = arith.truncf %29 : vector<16x32xf32> to vector<16x32xbf16>
    %c0_12 = arith.constant 0 : index
    %c0_13 = arith.constant 0 : index
    %c0_14 = arith.constant 0 : index
    %31 = vector.load %arg9[%c0_12, %c0_13, %c0_14] : memref<1x32x96xbf16, #tpu.memory_space<vmem>>, vector<1x32x96xbf16>
    %32 = vector.shape_cast %31 : vector<1x32x96xbf16> to vector<32x96xbf16>
    %cst_15 = arith.constant dense<0.000000e+00> : vector<16x96xf32>
    %33 = tpu.matmul %30, %32, %cst_15 {dimension_numbers = #tpu.dot_dimension_numbers<[1], [0], [0], [1], [0, 0, 1, 1], [], []>} : vector<16x32xbf16>, vector<32x96xbf16>, vector<16x96xf32> -> vector<16x96xf32>
    %c0_16 = arith.constant 0 : index
    %c0_17 = arith.constant 0 : index
    %c0_18 = arith.constant 0 : index
    %34 = vector.load %arg10[%c0_16, %c0_17, %c0_18] : memref<1x1x96xf32, #tpu.memory_space<vmem>>, vector<1x1x96xf32>
    %35 = vector.shape_cast %34 : vector<1x1x96xf32> to vector<1x96xf32>
    %36 = vector.broadcast %35 : vector<1x96xf32> to vector<16x96xf32>
    %37 = arith.addf %33, %36 : vector<16x96xf32>
    %38 = arith.truncf %37 : vector<16x96xf32> to vector<16x96xbf16>
    %39 = vector.extract_strided_slice %38 {offsets = [0, 0], sizes = [8, 16], strides = [1, 1]} : vector<16x96xbf16> to vector<8x16xbf16>
    %40 = vector.extract_strided_slice %38 {offsets = [0, 32], sizes = [5, 16], strides = [1, 1]} : vector<16x96xbf16> to vector<5x16xbf16>
    %41 = vector.extract_strided_slice %38 {offsets = [0, 64], sizes = [5, 16], strides = [1, 1]} : vector<16x96xbf16> to vector<5x16xbf16>
    %cst_19 = arith.constant dense<0.000000e+00> : vector<8x5xf32>
    %42 = tpu.matmul %39, %40, %cst_19 {dimension_numbers = #tpu.dot_dimension_numbers<[1], [1], [0], [0], [0, 0, 1, 0], [], []>} : vector<8x16xbf16>, vector<5x16xbf16>, vector<8x5xf32> -> vector<8x5xf32>
    %cst_20 = arith.constant dense<0xFF800000> : vector<8xf32>
    %43 = vector.multi_reduction <maximumf>, %42, %cst_20 [1] : vector<8x5xf32> to vector<8xf32>
    %44 = vector.shape_cast %43 : vector<8xf32> to vector<8x1xf32>
    %45 = vector.broadcast %44 : vector<8x1xf32> to vector<8x5xf32>
    %46 = arith.subf %42, %45 : vector<8x5xf32>
    %47 = math.exp %46 : vector<8x5xf32>
    %cst_21 = arith.constant dense<0.000000e+00> : vector<8xf32>
    %48 = vector.multi_reduction <add>, %47, %cst_21 [1] : vector<8x5xf32> to vector<8xf32>
    %49 = vector.shape_cast %48 : vector<8xf32> to vector<8x1xf32>
    %50 = tpu.reciprocal %49 {approx = true} : vector<8x1xf32> -> vector<8x1xf32>
    %51 = vector.broadcast %50 : vector<8x1xf32> to vector<8x5xf32>
    %52 = arith.mulf %47, %51 : vector<8x5xf32>
    %53 = arith.truncf %52 : vector<8x5xf32> to vector<8x5xbf16>
    %cst_22 = arith.constant dense<0.000000e+00> : vector<8x16xf32>
    %54 = tpu.matmul %53, %41, %cst_22 {dimension_numbers = #tpu.dot_dimension_numbers<[1], [0], [0], [1], [0, 0, 1, 1], [], []>} : vector<8x5xbf16>, vector<5x16xbf16>, vector<8x16xf32> -> vector<8x16xf32>
    %c0_23 = arith.constant 0 : index
    %c0_24 = arith.constant 0 : index
    %55 = vector.load %arg28[%c0_23, %c0_24] : memref<16x32xf32, #tpu.memory_space<vmem>>, vector<8x16xf32>
    tpu.vector_store %arg28[%c0_23, %c0_24], %54 {strides = array<i32>} : memref<16x32xf32, #tpu.memory_space<vmem>>, vector<8x16xf32>,
    %56 = vector.extract_strided_slice %38 {offsets = [0, 16], sizes = [8, 16], strides = [1, 1]} : vector<16x96xbf16> to vector<8x16xbf16>
    %57 = vector.extract_strided_slice %38 {offsets = [0, 48], sizes = [5, 16], strides = [1, 1]} : vector<16x96xbf16> to vector<5x16xbf16>
    %58 = vector.extract_strided_slice %38 {offsets = [0, 80], sizes = [5, 16], strides = [1, 1]} : vector<16x96xbf16> to vector<5x16xbf16>
    %cst_25 = arith.constant dense<0.000000e+00> : vector<8x5xf32>
    %59 = tpu.matmul %56, %57, %cst_25 {dimension_numbers = #tpu.dot_dimension_numbers<[1], [1], [0], [0], [0, 0, 1, 0], [], []>} : vector<8x16xbf16>, vector<5x16xbf16>, vector<8x5xf32> -> vector<8x5xf32>
    %cst_26 = arith.constant dense<0xFF800000> : vector<8xf32>
    %60 = vector.multi_reduction <maximumf>, %59, %cst_26 [1] : vector<8x5xf32> to vector<8xf32>
    %61 = vector.shape_cast %60 : vector<8xf32> to vector<8x1xf32>
    %62 = vector.broadcast %61 : vector<8x1xf32> to vector<8x5xf32>
    %63 = arith.subf %59, %62 : vector<8x5xf32>
    %64 = math.exp %63 : vector<8x5xf32>
    %cst_27 = arith.constant dense<0.000000e+00> : vector<8xf32>
    %65 = vector.multi_reduction <add>, %64, %cst_27 [1] : vector<8x5xf32> to vector<8xf32>
    %66 = vector.shape_cast %65 : vector<8xf32> to vector<8x1xf32>
    %67 = tpu.reciprocal %66 {approx = true} : vector<8x1xf32> -> vector<8x1xf32>
    %68 = vector.broadcast %67 : vector<8x1xf32> to vector<8x5xf32>
    %69 = arith.mulf %64, %68 : vector<8x5xf32>
    %70 = arith.truncf %69 : vector<8x5xf32> to vector<8x5xbf16>
    %cst_28 = arith.constant dense<0.000000e+00> : vector<8x16xf32>
    %71 = tpu.matmul %70, %58, %cst_28 {dimension_numbers = #tpu.dot_dimension_numbers<[1], [0], [0], [1], [0, 0, 1, 1], [], []>} : vector<8x5xbf16>, vector<5x16xbf16>, vector<8x16xf32> -> vector<8x16xf32>
    %c0_29 = arith.constant 0 : index
    %c16 = arith.constant 16 : index
    %72 = vector.load %arg28[%c0_29, %c16] : memref<16x32xf32, #tpu.memory_space<vmem>>, vector<8x16xf32>
    tpu.vector_store %arg28[%c0_29, %c16], %71 {strides = array<i32>} : memref<16x32xf32, #tpu.memory_space<vmem>>, vector<8x16xf32>,
    %73 = vector.extract_strided_slice %38 {offsets = [8, 0], sizes = [8, 16], strides = [1, 1]} : vector<16x96xbf16> to vector<8x16xbf16>
    %74 = vector.extract_strided_slice %38 {offsets = [8, 32], sizes = [5, 16], strides = [1, 1]} : vector<16x96xbf16> to vector<5x16xbf16>
    %75 = vector.extract_strided_slice %38 {offsets = [8, 64], sizes = [5, 16], strides = [1, 1]} : vector<16x96xbf16> to vector<5x16xbf16>
    %cst_30 = arith.constant dense<0.000000e+00> : vector<8x5xf32>
    %76 = tpu.matmul %73, %74, %cst_30 {dimension_numbers = #tpu.dot_dimension_numbers<[1], [1], [0], [0], [0, 0, 1, 0], [], []>} : vector<8x16xbf16>, vector<5x16xbf16>, vector<8x5xf32> -> vector<8x5xf32>
    %cst_31 = arith.constant dense<0xFF800000> : vector<8xf32>
    %77 = vector.multi_reduction <maximumf>, %76, %cst_31 [1] : vector<8x5xf32> to vector<8xf32>
    %78 = vector.shape_cast %77 : vector<8xf32> to vector<8x1xf32>
    %79 = vector.broadcast %78 : vector<8x1xf32> to vector<8x5xf32>
    %80 = arith.subf %76, %79 : vector<8x5xf32>
    %81 = math.exp %80 : vector<8x5xf32>
    %cst_32 = arith.constant dense<0.000000e+00> : vector<8xf32>
    %82 = vector.multi_reduction <add>, %81, %cst_32 [1] : vector<8x5xf32> to vector<8xf32>
    %83 = vector.shape_cast %82 : vector<8xf32> to vector<8x1xf32>
    %84 = tpu.reciprocal %83 {approx = true} : vector<8x1xf32> -> vector<8x1xf32>
    %85 = vector.broadcast %84 : vector<8x1xf32> to vector<8x5xf32>
    %86 = arith.mulf %81, %85 : vector<8x5xf32>
    %87 = arith.truncf %86 : vector<8x5xf32> to vector<8x5xbf16>
    %cst_33 = arith.constant dense<0.000000e+00> : vector<8x16xf32>
    %88 = tpu.matmul %87, %75, %cst_33 {dimension_numbers = #tpu.dot_dimension_numbers<[1], [0], [0], [1], [0, 0, 1, 1], [], []>} : vector<8x5xbf16>, vector<5x16xbf16>, vector<8x16xf32> -> vector<8x16xf32>
    %c8 = arith.constant 8 : index
    %c0_34 = arith.constant 0 : index
    %89 = vector.load %arg28[%c8, %c0_34] : memref<16x32xf32, #tpu.memory_space<vmem>>, vector<8x16xf32>
    tpu.vector_store %arg28[%c8, %c0_34], %88 {strides = array<i32>} : memref<16x32xf32, #tpu.memory_space<vmem>>, vector<8x16xf32>,
    %90 = vector.extract_strided_slice %38 {offsets = [8, 16], sizes = [8, 16], strides = [1, 1]} : vector<16x96xbf16> to vector<8x16xbf16>
    %91 = vector.extract_strided_slice %38 {offsets = [8, 48], sizes = [5, 16], strides = [1, 1]} : vector<16x96xbf16> to vector<5x16xbf16>
    %92 = vector.extract_strided_slice %38 {offsets = [8, 80], sizes = [5, 16], strides = [1, 1]} : vector<16x96xbf16> to vector<5x16xbf16>
    %cst_35 = arith.constant dense<0.000000e+00> : vector<8x5xf32>
    %93 = tpu.matmul %90, %91, %cst_35 {dimension_numbers = #tpu.dot_dimension_numbers<[1], [1], [0], [0], [0, 0, 1, 0], [], []>} : vector<8x16xbf16>, vector<5x16xbf16>, vector<8x5xf32> -> vector<8x5xf32>
    %cst_36 = arith.constant dense<0xFF800000> : vector<8xf32>
    %94 = vector.multi_reduction <maximumf>, %93, %cst_36 [1] : vector<8x5xf32> to vector<8xf32>
    %95 = vector.shape_cast %94 : vector<8xf32> to vector<8x1xf32>
    %96 = vector.broadcast %95 : vector<8x1xf32> to vector<8x5xf32>
    %97 = arith.subf %93, %96 : vector<8x5xf32>
    %98 = math.exp %97 : vector<8x5xf32>
    %cst_37 = arith.constant dense<0.000000e+00> : vector<8xf32>
    %99 = vector.multi_reduction <add>, %98, %cst_37 [1] : vector<8x5xf32> to vector<8xf32>
    %100 = vector.shape_cast %99 : vector<8xf32> to vector<8x1xf32>
    %101 = tpu.reciprocal %100 {approx = true} : vector<8x1xf32> -> vector<8x1xf32>
    %102 = vector.broadcast %101 : vector<8x1xf32> to vector<8x5xf32>
    %103 = arith.mulf %98, %102 : vector<8x5xf32>
    %104 = arith.truncf %103 : vector<8x5xf32> to vector<8x5xbf16>
    %cst_38 = arith.constant dense<0.000000e+00> : vector<8x16xf32>
    %105 = tpu.matmul %104, %92, %cst_38 {dimension_numbers = #tpu.dot_dimension_numbers<[1], [0], [0], [1], [0, 0, 1, 1], [], []>} : vector<8x5xbf16>, vector<5x16xbf16>, vector<8x16xf32> -> vector<8x16xf32>
    %c8_39 = arith.constant 8 : index
    %c16_40 = arith.constant 16 : index
    %106 = vector.load %arg28[%c8_39, %c16_40] : memref<16x32xf32, #tpu.memory_space<vmem>>, vector<8x16xf32>
    tpu.vector_store %arg28[%c8_39, %c16_40], %105 {strides = array<i32>} : memref<16x32xf32, #tpu.memory_space<vmem>>, vector<8x16xf32>,
    %c0_41 = arith.constant 0 : index
    %c0_42 = arith.constant 0 : index
    %107 = vector.load %arg28[%c0_41, %c0_42] : memref<16x32xf32, #tpu.memory_space<vmem>>, vector<16x32xf32>
    %108 = arith.truncf %107 : vector<16x32xf32> to vector<16x32xbf16>
    %c0_43 = arith.constant 0 : index
    %c0_44 = arith.constant 0 : index
    %c0_45 = arith.constant 0 : index
    %109 = vector.load %arg11[%c0_43, %c0_44, %c0_45] : memref<1x32x32xbf16, #tpu.memory_space<vmem>>, vector<1x32x32xbf16>
    %110 = vector.shape_cast %109 : vector<1x32x32xbf16> to vector<32x32xbf16>
    %cst_46 = arith.constant dense<0.000000e+00> : vector<16x32xf32>
    %111 = tpu.matmul %108, %110, %cst_46 {dimension_numbers = #tpu.dot_dimension_numbers<[1], [0], [0], [1], [0, 0, 1, 1], [], []>} : vector<16x32xbf16>, vector<32x32xbf16>, vector<16x32xf32> -> vector<16x32xf32>
    %c0_47 = arith.constant 0 : index
    %c0_48 = arith.constant 0 : index
    %c0_49 = arith.constant 0 : index
    %112 = vector.load %arg12[%c0_47, %c0_48, %c0_49] : memref<1x1x32xf32, #tpu.memory_space<vmem>>, vector<1x1x32xf32>
    %113 = vector.shape_cast %112 : vector<1x1x32xf32> to vector<1x32xf32>
    %114 = vector.broadcast %113 : vector<1x32xf32> to vector<16x32xf32>
    %115 = arith.addf %111, %114 : vector<16x32xf32>
    %116 = arith.addf %3, %115 : vector<16x32xf32>
    %c0_50 = arith.constant 0 : index
    %c0_51 = arith.constant 0 : index
    %c0_52 = arith.constant 0 : index
    %117 = vector.load %arg13[%c0_50, %c0_51, %c0_52] : memref<1x1x32xf32, #tpu.memory_space<vmem>>, vector<1x1x32xf32>
    %118 = vector.shape_cast %117 : vector<1x1x32xf32> to vector<1x32xf32>
    %c0_53 = arith.constant 0 : index
    %c0_54 = arith.constant 0 : index
    %c0_55 = arith.constant 0 : index
    %119 = vector.load %arg14[%c0_53, %c0_54, %c0_55] : memref<1x1x32xf32, #tpu.memory_space<vmem>>, vector<1x1x32xf32>
    %120 = vector.shape_cast %119 : vector<1x1x32xf32> to vector<1x32xf32>
    %cst_56 = arith.constant dense<0.000000e+00> : vector<16xf32>
    %121 = vector.multi_reduction <add>, %116, %cst_56 [1] : vector<16x32xf32> to vector<16xf32>
    %122 = vector.shape_cast %121 : vector<16xf32> to vector<16x1xf32>
    %cst_57 = arith.constant 3.200000e+01 : f32
    %123 = vector.broadcast %cst_57 : f32 to vector<16x1xf32>
    %124 = arith.divf %122, %123 : vector<16x1xf32>
    %125 = vector.broadcast %124 : vector<16x1xf32> to vector<16x32xf32>
    %126 = arith.subf %116, %125 : vector<16x32xf32>
    %127 = arith.mulf %126, %126 : vector<16x32xf32>
    %cst_58 = arith.constant dense<0.000000e+00> : vector<16xf32>
    %128 = vector.multi_reduction <add>, %127, %cst_58 [1] : vector<16x32xf32> to vector<16xf32>
    %129 = vector.shape_cast %128 : vector<16xf32> to vector<16x1xf32>
    %cst_59 = arith.constant 3.200000e+01 : f32
    %130 = vector.broadcast %cst_59 : f32 to vector<16x1xf32>
    %131 = arith.divf %129, %130 : vector<16x1xf32>
    %132 = vector.broadcast %124 : vector<16x1xf32> to vector<16x32xf32>
    %133 = arith.subf %116, %132 : vector<16x32xf32>
    %cst_60 = arith.constant 9.99999974E-6 : f32
    %134 = vector.broadcast %cst_60 : f32 to vector<16x1xf32>
    %135 = arith.addf %131, %134 : vector<16x1xf32>
    %136 = math.rsqrt %135 : vector<16x1xf32>
    %137 = vector.broadcast %136 : vector<16x1xf32> to vector<16x32xf32>
    %138 = arith.mulf %133, %137 : vector<16x32xf32>
    %139 = vector.broadcast %118 : vector<1x32xf32> to vector<16x32xf32>
    %140 = arith.mulf %138, %139 : vector<16x32xf32>
    %141 = vector.broadcast %120 : vector<1x32xf32> to vector<16x32xf32>
    %142 = arith.addf %140, %141 : vector<16x32xf32>
    %143 = arith.truncf %142 : vector<16x32xf32> to vector<16x32xbf16>
    %c0_61 = arith.constant 0 : index
    %c0_62 = arith.constant 0 : index
    %c0_63 = arith.constant 0 : index
    %144 = vector.load %arg15[%c0_61, %c0_62, %c0_63] : memref<1x32x128xbf16, #tpu.memory_space<vmem>>, vector<1x32x128xbf16>
    %145 = vector.shape_cast %144 : vector<1x32x128xbf16> to vector<32x128xbf16>
    %cst_64 = arith.constant dense<0.000000e+00> : vector<16x128xf32>
    %146 = tpu.matmul %143, %145, %cst_64 {dimension_numbers = #tpu.dot_dimension_numbers<[1], [0], [0], [1], [0, 0, 1, 1], [], []>} : vector<16x32xbf16>, vector<32x128xbf16>, vector<16x128xf32> -> vector<16x128xf32>
    %c0_65 = arith.constant 0 : index
    %c0_66 = arith.constant 0 : index
    %c0_67 = arith.constant 0 : index
    %147 = vector.load %arg16[%c0_65, %c0_66, %c0_67] : memref<1x1x128xf32, #tpu.memory_space<vmem>>, vector<1x1x128xf32>
    %148 = vector.shape_cast %147 : vector<1x1x128xf32> to vector<1x128xf32>
    %149 = vector.broadcast %148 : vector<1x128xf32> to vector<16x128xf32>
    %150 = arith.addf %146, %149 : vector<16x128xf32>
    %cst_68 = arith.constant 1.702000e+00 : f32
    %151 = vector.broadcast %cst_68 : f32 to vector<16x128xf32>
    %152 = arith.mulf %151, %150 : vector<16x128xf32>
    %153 = arith.negf %152 : vector<16x128xf32>
    %154 = math.exp %153 : vector<16x128xf32>
    %cst_69 = arith.constant 1.000000e+00 : f32
    %155 = vector.broadcast %cst_69 : f32 to vector<16x128xf32>
    %156 = arith.addf %155, %154 : vector<16x128xf32>
    %157 = arith.divf %155, %156 : vector<16x128xf32>
    %158 = arith.mulf %150, %157 : vector<16x128xf32>
    %159 = arith.truncf %158 : vector<16x128xf32> to vector<16x128xbf16>
    %c0_70 = arith.constant 0 : index
    %c0_71 = arith.constant 0 : index
    %c0_72 = arith.constant 0 : index
    %160 = vector.load %arg17[%c0_70, %c0_71, %c0_72] : memref<1x128x32xbf16, #tpu.memory_space<vmem>>, vector<1x128x32xbf16>
    %161 = vector.shape_cast %160 : vector<1x128x32xbf16> to vector<128x32xbf16>
    %cst_73 = arith.constant dense<0.000000e+00> : vector<16x32xf32>
    %162 = tpu.matmul %159, %161, %cst_73 {dimension_numbers = #tpu.dot_dimension_numbers<[1], [0], [0], [1], [0, 0, 1, 1], [], []>} : vector<16x128xbf16>, vector<128x32xbf16>, vector<16x32xf32> -> vector<16x32xf32>
    %163 = arith.addf %116, %162 : vector<16x32xf32>
    %c0_74 = arith.constant 0 : index
    %c0_75 = arith.constant 0 : index
    %c0_76 = arith.constant 0 : index
    %164 = vector.load %arg18[%c0_74, %c0_75, %c0_76] : memref<1x1x32xf32, #tpu.memory_space<vmem>>, vector<1x1x32xf32>
    %165 = vector.shape_cast %164 : vector<1x1x32xf32> to vector<1x32xf32>
    %166 = vector.broadcast %165 : vector<1x32xf32> to vector<16x32xf32>
    %167 = arith.addf %163, %166 : vector<16x32xf32>
    %c0_77 = arith.constant 0 : index
    %c0_78 = arith.constant 0 : index
    %168 = vector.load %arg27[%c0_77, %c0_78] : memref<16x32xf32, #tpu.memory_space<vmem>>, vector<16x32xf32>
    tpu.vector_store %arg27[%c0_77, %c0_78], %167 {strides = array<i32>} : memref<16x32xf32, #tpu.memory_space<vmem>>, vector<16x32xf32>,
    %c1_i32 = arith.constant 1 : i32
    %169 = arith.cmpi eq, %arg1, %c1_i32 : i32
    %170 = arith.extui %169 : i1 to i32
    %c0_i32_79 = arith.constant 0 : i32
    %171 = arith.cmpi ne, %170, %c0_i32_79 : i32
    scf.if %171 {
      %172 = vector.extract_strided_slice %167 {offsets = [0, 0], sizes = [1, 32], strides = [1, 1]} : vector<16x32xf32> to vector<1x32xf32>
      %c0_80 = arith.constant 0 : index
      %c0_81 = arith.constant 0 : index
      %173 = vector.load %arg29[%c0_80, %c0_81] : memref<2x32xf32, #tpu.memory_space<vmem>>, vector<1x32xf32>
      tpu.vector_store %arg29[%c0_80, %c0_81], %172 {strides = array<i32>} : memref<2x32xf32, #tpu.memory_space<vmem>>, vector<1x32xf32>,
      %174 = vector.extract_strided_slice %167 {offsets = [8, 0], sizes = [1, 32], strides = [1, 1]} : vector<16x32xf32> to vector<1x32xf32>
      %c1 = arith.constant 1 : index
      %c0_82 = arith.constant 0 : index
      %175 = vector.load %arg29[%c1, %c0_82] : memref<2x32xf32, #tpu.memory_space<vmem>>, vector<1x32xf32>
      tpu.vector_store %arg29[%c1, %c0_82], %174 {strides = array<i32>} : memref<2x32xf32, #tpu.memory_space<vmem>>, vector<1x32xf32>,
      %c0_83 = arith.constant 0 : index
      %c0_84 = arith.constant 0 : index
      %176 = vector.load %arg29[%c0_83, %c0_84] : memref<2x32xf32, #tpu.memory_space<vmem>>, vector<2x32xf32>
      %c0_85 = arith.constant 0 : index
      %c0_86 = arith.constant 0 : index
      %177 = vector.load %arg19[%c0_85, %c0_86] : memref<1x32xf32, #tpu.memory_space<vmem>>, vector<1x32xf32>
      %c0_87 = arith.constant 0 : index
      %c0_88 = arith.constant 0 : index
      %178 = vector.load %arg20[%c0_87, %c0_88] : memref<1x32xf32, #tpu.memory_space<vmem>>, vector<1x32xf32>
      %cst_89 = arith.constant dense<0.000000e+00> : vector<2xf32>
      %179 = vector.multi_reduction <add>, %176, %cst_89 [1] : vector<2x32xf32> to vector<2xf32>
      %180 = vector.shape_cast %179 : vector<2xf32> to vector<2x1xf32>
      %cst_90 = arith.constant 3.200000e+01 : f32
      %181 = vector.broadcast %cst_90 : f32 to vector<2x1xf32>
      %182 = arith.divf %180, %181 : vector<2x1xf32>
      %183 = vector.broadcast %182 : vector<2x1xf32> to vector<2x32xf32>
      %184 = arith.subf %176, %183 : vector<2x32xf32>
      %185 = arith.mulf %184, %184 : vector<2x32xf32>
      %cst_91 = arith.constant dense<0.000000e+00> : vector<2xf32>
      %186 = vector.multi_reduction <add>, %185, %cst_91 [1] : vector<2x32xf32> to vector<2xf32>
      %187 = vector.shape_cast %186 : vector<2xf32> to vector<2x1xf32>
      %cst_92 = arith.constant 3.200000e+01 : f32
      %188 = vector.broadcast %cst_92 : f32 to vector<2x1xf32>
      %189 = arith.divf %187, %188 : vector<2x1xf32>
      %190 = vector.broadcast %182 : vector<2x1xf32> to vector<2x32xf32>
      %191 = arith.subf %176, %190 : vector<2x32xf32>
      %cst_93 = arith.constant 9.99999974E-6 : f32
      %192 = vector.broadcast %cst_93 : f32 to vector<2x1xf32>
      %193 = arith.addf %189, %192 : vector<2x1xf32>
      %194 = math.rsqrt %193 : vector<2x1xf32>
      %195 = vector.broadcast %194 : vector<2x1xf32> to vector<2x32xf32>
      %196 = arith.mulf %191, %195 : vector<2x32xf32>
      %197 = vector.broadcast %177 : vector<1x32xf32> to vector<2x32xf32>
      %198 = arith.mulf %196, %197 : vector<2x32xf32>
      %199 = vector.broadcast %178 : vector<1x32xf32> to vector<2x32xf32>
      %200 = arith.addf %198, %199 : vector<2x32xf32>
      %201 = arith.truncf %200 : vector<2x32xf32> to vector<2x32xbf16>
      %c0_94 = arith.constant 0 : index
      %c0_95 = arith.constant 0 : index
      %202 = vector.load %arg21[%c0_94, %c0_95] : memref<32x16xbf16, #tpu.memory_space<vmem>>, vector<32x16xbf16>
      %cst_96 = arith.constant dense<0.000000e+00> : vector<2x16xf32>
      %203 = tpu.matmul %201, %202, %cst_96 {dimension_numbers = #tpu.dot_dimension_numbers<[1], [0], [0], [1], [0, 0, 1, 1], [], []>} : vector<2x32xbf16>, vector<32x16xbf16>, vector<2x16xf32> -> vector<2x16xf32>
      %204 = arith.truncf %203 : vector<2x16xf32> to vector<2x16xbf16>
      %c0_97 = arith.constant 0 : index
      %c0_98 = arith.constant 0 : index
      %205 = vector.load %arg22[%c0_97, %c0_98] : memref<16x32xbf16, #tpu.memory_space<vmem>>, vector<16x32xbf16>
      %cst_99 = arith.constant dense<0.000000e+00> : vector<2x32xf32>
      %206 = tpu.matmul %204, %205, %cst_99 {dimension_numbers = #tpu.dot_dimension_numbers<[1], [0], [0], [1], [0, 0, 1, 1], [], []>} : vector<2x16xbf16>, vector<16x32xbf16>, vector<2x32xf32> -> vector<2x32xf32>
      %c0_100 = arith.constant 0 : index
      %c0_101 = arith.constant 0 : index
      %207 = vector.load %arg23[%c0_100, %c0_101] : memref<1x32xf32, #tpu.memory_space<vmem>>, vector<1x32xf32>
      %208 = vector.broadcast %207 : vector<1x32xf32> to vector<2x32xf32>
      %209 = arith.addf %206, %208 : vector<2x32xf32>
      %cst_102 = arith.constant 0.000000e+00 : f32
      %210 = vector.broadcast %cst_102 : f32 to vector<2x32xf32>
      %211 = arith.maximumf %209, %210 : vector<2x32xf32>
      %212 = arith.truncf %211 : vector<2x32xf32> to vector<2x32xbf16>
      %c0_103 = arith.constant 0 : index
      %c0_104 = arith.constant 0 : index
      %213 = vector.load %arg24[%c0_103, %c0_104] : memref<32x4xbf16, #tpu.memory_space<vmem>>, vector<32x4xbf16>
      %cst_105 = arith.constant dense<0.000000e+00> : vector<2x4xf32>
      %214 = tpu.matmul %212, %213, %cst_105 {dimension_numbers = #tpu.dot_dimension_numbers<[1], [0], [0], [1], [0, 0, 1, 1], [], []>} : vector<2x32xbf16>, vector<32x4xbf16>, vector<2x4xf32> -> vector<2x4xf32>
      %c0_106 = arith.constant 0 : index
      %c0_107 = arith.constant 0 : index
      %215 = vector.load %arg25[%c0_106, %c0_107] : memref<1x4xf32, #tpu.memory_space<vmem>>, vector<1x4xf32>
      %216 = vector.broadcast %215 : vector<1x4xf32> to vector<2x4xf32>
      %217 = arith.addf %214, %216 : vector<2x4xf32>
      %c0_108 = arith.constant 0 : index
      %c0_109 = arith.constant 0 : index
      %c0_110 = arith.constant 0 : index
      %218 = vector.load %arg26[%c0_108, %c0_109, %c0_110] : memref<1x2x4xf32, #tpu.memory_space<vmem>>, vector<1x2x4xf32>
      %219 = vector.shape_cast %218 : vector<1x2x4xf32> to vector<2x4xf32>
      %220 = vector.shape_cast %217 : vector<2x4xf32> to vector<1x2x4xf32>
      tpu.vector_store %arg26[%c0_108, %c0_109, %c0_110], %220 {strides = array<i32>} : memref<1x2x4xf32, #tpu.memory_space<vmem>>, vector<1x2x4xf32>,
    } else {
    }
    return
  }
  func.func @transform_0(%arg0: i32, %arg1: i32) -> (i32, i32, i32) {
    %c0_i32 = arith.constant 0 : i32
    %c0_i32_0 = arith.constant 0 : i32
    %c0_i32_1 = arith.constant 0 : i32
    return %arg0, %c0_i32, %c0_i32_0 : i32, i32, i32
  }
  func.func @transform_1(%arg0: i32, %arg1: i32) -> (i32, i32) {
    %c0_i32 = arith.constant 0 : i32
    %c0_i32_0 = arith.constant 0 : i32
    %c0_i32_1 = arith.constant 0 : i32
    return %c0_i32, %c0_i32_0 : i32, i32
  }
  func.func @transform_2(%arg0: i32, %arg1: i32) -> (i32, i32) {
    %c0_i32 = arith.constant 0 : i32
    %c0_i32_0 = arith.constant 0 : i32
    %c0_i32_1 = arith.constant 0 : i32
    return %c0_i32, %c0_i32_0 : i32, i32
  }
  func.func @transform_3(%arg0: i32, %arg1: i32) -> (i32, i32) {
    %c0_i32 = arith.constant 0 : i32
    %c0_i32_0 = arith.constant 0 : i32
    %c0_i32_1 = arith.constant 0 : i32
    return %c0_i32, %c0_i32_0 : i32, i32
  }
  func.func @transform_4(%arg0: i32, %arg1: i32) -> (i32, i32) {
    %c0_i32 = arith.constant 0 : i32
    %c0_i32_0 = arith.constant 0 : i32
    %c0_i32_1 = arith.constant 0 : i32
    return %c0_i32, %c0_i32_0 : i32, i32
  }
  func.func @transform_5(%arg0: i32, %arg1: i32) -> (i32, i32, i32) {
    %c0_i32 = arith.constant 0 : i32
    %c0_i32_0 = arith.constant 0 : i32
    %c0_i32_1 = arith.constant 0 : i32
    return %arg1, %c0_i32, %c0_i32_0 : i32, i32, i32
  }
  func.func @transform_6(%arg0: i32, %arg1: i32) -> (i32, i32, i32) {
    %c0_i32 = arith.constant 0 : i32
    %c0_i32_0 = arith.constant 0 : i32
    %c0_i32_1 = arith.constant 0 : i32
    return %arg1, %c0_i32, %c0_i32_0 : i32, i32, i32
  }
  func.func @transform_7(%arg0: i32, %arg1: i32) -> (i32, i32, i32) {
    %c0_i32 = arith.constant 0 : i32
    %c0_i32_0 = arith.constant 0 : i32
    %c0_i32_1 = arith.constant 0 : i32
    return %arg1, %c0_i32, %c0_i32_0 : i32, i32, i32
  }
  func.func @transform_8(%arg0: i32, %arg1: i32) -> (i32, i32, i32) {
    %c0_i32 = arith.constant 0 : i32
    %c0_i32_0 = arith.constant 0 : i32
    %c0_i32_1 = arith.constant 0 : i32
    return %arg1, %c0_i32, %c0_i32_0 : i32, i32, i32
  }
  func.func @transform_9(%arg0: i32, %arg1: i32) -> (i32, i32, i32) {
    %c0_i32 = arith.constant 0 : i32
    %c0_i32_0 = arith.constant 0 : i32
    %c0_i32_1 = arith.constant 0 : i32
    return %arg1, %c0_i32, %c0_i32_0 : i32, i32, i32
  }
  func.func @transform_10(%arg0: i32, %arg1: i32) -> (i32, i32, i32) {
    %c0_i32 = arith.constant 0 : i32
    %c0_i32_0 = arith.constant 0 : i32
    %c0_i32_1 = arith.constant 0 : i32
    return %arg1, %c0_i32, %c0_i32_0 : i32, i32, i32
  }
  func.func @transform_11(%arg0: i32, %arg1: i32) -> (i32, i32, i32) {
    %c0_i32 = arith.constant 0 : i32
    %c0_i32_0 = arith.constant 0 : i32
    %c0_i32_1 = arith.constant 0 : i32
    return %arg1, %c0_i32, %c0_i32_0 : i32, i32, i32
  }
  func.func @transform_12(%arg0: i32, %arg1: i32) -> (i32, i32, i32) {
    %c0_i32 = arith.constant 0 : i32
    %c0_i32_0 = arith.constant 0 : i32
    %c0_i32_1 = arith.constant 0 : i32
    return %arg1, %c0_i32, %c0_i32_0 : i32, i32, i32
  }
  func.func @transform_13(%arg0: i32, %arg1: i32) -> (i32, i32, i32) {
    %c0_i32 = arith.constant 0 : i32
    %c0_i32_0 = arith.constant 0 : i32
    %c0_i32_1 = arith.constant 0 : i32
    return %arg1, %c0_i32, %c0_i32_0 : i32, i32, i32
  }
  func.func @transform_14(%arg0: i32, %arg1: i32) -> (i32, i32, i32) {
    %c0_i32 = arith.constant 0 : i32
    %c0_i32_0 = arith.constant 0 : i32
    %c0_i32_1 = arith.constant 0 : i32
    return %arg1, %c0_i32, %c0_i32_0 : i32, i32, i32
  }
  func.func @transform_15(%arg0: i32, %arg1: i32) -> (i32, i32, i32) {
    %c0_i32 = arith.constant 0 : i32
    %c0_i32_0 = arith.constant 0 : i32
    %c0_i32_1 = arith.constant 0 : i32
    return %arg1, %c0_i32, %c0_i32_0 : i32, i32, i32
  }
  func.func @transform_16(%arg0: i32, %arg1: i32) -> (i32, i32, i32) {
    %c0_i32 = arith.constant 0 : i32
    %c0_i32_0 = arith.constant 0 : i32
    %c0_i32_1 = arith.constant 0 : i32
    return %arg1, %c0_i32, %c0_i32_0 : i32, i32, i32
  }
  func.func @transform_17(%arg0: i32, %arg1: i32) -> (i32, i32) {
    %c0_i32 = arith.constant 0 : i32
    %c0_i32_0 = arith.constant 0 : i32
    %c0_i32_1 = arith.constant 0 : i32
    return %c0_i32, %c0_i32_0 : i32, i32
  }
  func.func @transform_18(%arg0: i32, %arg1: i32) -> (i32, i32) {
    %c0_i32 = arith.constant 0 : i32
    %c0_i32_0 = arith.constant 0 : i32
    %c0_i32_1 = arith.constant 0 : i32
    return %c0_i32, %c0_i32_0 : i32, i32
  }
  func.func @transform_19(%arg0: i32, %arg1: i32) -> (i32, i32) {
    %c0_i32 = arith.constant 0 : i32
    %c0_i32_0 = arith.constant 0 : i32
    %c0_i32_1 = arith.constant 0 : i32
    return %c0_i32, %c0_i32_0 : i32, i32
  }
  func.func @transform_20(%arg0: i32, %arg1: i32) -> (i32, i32) {
    %c0_i32 = arith.constant 0 : i32
    %c0_i32_0 = arith.constant 0 : i32
    %c0_i32_1 = arith.constant 0 : i32
    return %c0_i32, %c0_i32_0 : i32, i32
  }
  func.func @transform_21(%arg0: i32, %arg1: i32) -> (i32, i32) {
    %c0_i32 = arith.constant 0 : i32
    %c0_i32_0 = arith.constant 0 : i32
    %c0_i32_1 = arith.constant 0 : i32
    return %c0_i32, %c0_i32_0 : i32, i32
  }
  func.func @transform_22(%arg0: i32, %arg1: i32) -> (i32, i32) {
    %c0_i32 = arith.constant 0 : i32
    %c0_i32_0 = arith.constant 0 : i32
    %c0_i32_1 = arith.constant 0 : i32
    return %c0_i32, %c0_i32_0 : i32, i32
  }
  func.func @transform_23(%arg0: i32, %arg1: i32) -> (i32, i32) {
    %c0_i32 = arith.constant 0 : i32
    %c0_i32_0 = arith.constant 0 : i32
    %c0_i32_1 = arith.constant 0 : i32
    return %c0_i32, %c0_i32_0 : i32, i32
  }
  func.func @transform_24(%arg0: i32, %arg1: i32) -> (i32, i32, i32) {
    %c0_i32 = arith.constant 0 : i32
    %c0_i32_0 = arith.constant 0 : i32
    %c0_i32_1 = arith.constant 0 : i32
    return %arg0, %c0_i32, %c0_i32_0 : i32, i32, i32
  }
}

</mosaic_0001>

<bundles_post_ra>
// kernel: clip_with_mlp_forward.1
= control target key start
LH: loop header
LB: loop body
LE: loop exit
PB: predicated region body
PF: predicated region fallthrough
CT: control target
= control target key end

     0   :  { %s3446_s0 = inlined_call_operand.vmem [shape: f32[1,16,256], index: 0, kind: input, shape index: {}]   ;;  %s3447_s1 = inlined_call_operand.vmem [shape: f32[16,32], index: 1, kind: input, shape index: {}]   ;;  %s3448_s2 = inlined_call_operand.vmem [shape: f32[1,32], index: 2, kind: input, shape index: {}]   ;;  %s3449_s3 = inlined_call_operand.vmem [shape: f32[1,32], index: 3, kind: input, shape index: {}]   ;;  %s3450_s4 = inlined_call_operand.vmem [shape: bf16[256,32], index: 4, kind: input, shape index: {}]   ;;  %s3451_s5 = inlined_call_operand.vmem [shape: f32[2,1,32], index: 5, kind: input, shape index: {}]   ;;  %s3452_s6 = inlined_call_operand.vmem [shape: f32[2,1,32], index: 6, kind: input, shape index: {}]   ;;  %s3453_s7 = inlined_call_operand.vmem [shape: bf16[2,32,96], index: 7, kind: input, shape index: {}]   ;;  %s3454_s8 = inlined_call_operand.vmem [shape: f32[2,1,96], index: 8, kind: input, shape index: {}]   ;;  %s3455_s9 = inlined_call_operand.vmem [shape: bf16[2,32,32], index: 9, kind: input, shape index: {}]   ;;  %s3456_s10 = inlined_call_operand.vmem [shape: f32[2,1,32], index: 10, kind: input, shape index: {}]   ;;  %s3457_s11 = inlined_call_operand.vmem [shape: f32[2,1,32], index: 11, kind: input, shape index: {}]   ;;  %s3458_s12 = inlined_call_operand.vmem [shape: f32[2,1,32], index: 12, kind: input, shape index: {}]   ;;  %s3459_s13 = inlined_call_operand.vmem [shape: bf16[2,32,128], index: 13, kind: input, shape index: {}]   ;;  %s3460_s14 = inlined_call_operand.vmem [shape: f32[2,1,128], index: 14, kind: input, shape index: {}]   ;;  %s3461_s15 = inlined_call_operand.vmem [shape: bf16[2,128,32], index: 15, kind: input, shape index: {}]   ;;  %s3462_s16 = inlined_call_operand.vmem [shape: f32[2,1,32], index: 16, kind: input, shape index: {}]   ;;  %s3463_s17 = inlined_call_operand.vmem [shape: f32[1,32], index: 17, kind: input, shape index: {}]   ;;  %s3464_s18 = inlined_call_operand.vmem [shape: f32[1,32], index: 18, kind: input, shape index: {}]   ;;  %s3465_s19 = inlined_call_operand.vmem [shape: bf16[32,16], index: 19, kind: input, shape index: {}]   ;;  %s3466_s20 = inlined_call_operand.vmem [shape: bf16[16,32], index: 20, kind: input, shape index: {}]   ;;  %s3467_s21 = inlined_call_operand.vmem [shape: f32[1,32], index: 21, kind: input, shape index: {}]   ;;  %s3468_s22 = inlined_call_operand.vmem [shape: bf16[32,4], index: 22, kind: input, shape index: {}]   ;;  %s3469_s23 = inlined_call_operand.vmem [shape: f32[1,4], index: 23, kind: input, shape index: {}]   ;;  %s3470_s24 = inlined_call_operand.hbm [shape: f32[1,2,4], index: 24, kind: output, shape index: {}]  }
   0x1   :  { %3478 = sst [smem:[#allocation11_spill]] %s3446_s0 }
   0x2   :  { %3479 = sst [smem:[#allocation12_spill]] %s3447_s1 }
   0x3   :  { %3480 = sst [smem:[#allocation13_spill]] %s3448_s2 }
   0x4   :  { %3481 = sst [smem:[#allocation14_spill]] %s3449_s3 }
   0x5   :  { %3482 = sst [smem:[#allocation15_spill]] %s3450_s4 }
   0x6   :  { %3483 = sst [smem:[#allocation16_spill]] %s3451_s5 }
   0x7   :  { %3484 = sst [smem:[#allocation17_spill]] %s3452_s6 }
   0x8   :  { %3485 = sst [smem:[#allocation18_spill]] %s3453_s7 }
   0x9   :  { %3486 = sst [smem:[#allocation19_spill]] %s3454_s8 }
   0xa   :  { %3487 = sst [smem:[#allocation20_spill]] %s3455_s9 }
   0xb   :  { %3488 = sst [smem:[#allocation21_spill]] %s3466_s20 }
   0xc   :  { %3489 = sst [smem:[#allocation22_spill]] %s3467_s21 }
   0xd   :  { %3490 = sst [smem:[#allocation23_spill]] %s3468_s22 }
   0xe   :  { %3491 = sst [smem:[#allocation24_spill]] %s3469_s23 }
   0xf   :  { %3492 = sst [smem:[#allocation25_spill]] %s3470_s24 }
  0x10   :  { %29 = vsyncpa [#allocation6], 0  ;;  %s3037_s5 = smov 0   ;;  %s3039_s26 = smov 0  }
  0x11   :  { %s3041_s27 = smov 0  }
  0x12 LB: > { %3493 = sst [smem:[#allocation8_spill]] %s2894_s26  ;;  %s44_s6 = sadd.s32 1, %s2894_s26  ;;  %s2898_s27 = sphi %s3041_s27, %s35_s27   ;;  %s2894_s26 = sphi %s3039_s26, %s3525_s26   ;;  %s2890_s5 = sphi %s3037_s5, %s3524_s5  }
  0x13   : > { %3494 = sst [smem:[#allocation9_spill]] %s2898_s27  ;;  %p45_p0 = scmp.ge.s32.totalorder %s44_s6, 2 }
  0x14   : > { %p2469_p1 = scmp.ge.s32.totalorder %s2898_s27, 1  ;;  %p779_p2 = scmp.lt.s32.totalorder %s2898_s27, 3 }
  0x15   : > { %s3527_s6 = smov (%p45_p0, %s44_s6), 0 }
  0x16   : > { %3495 = sst [smem:[#allocation10_spill]] %s3527_s6  ;;  %p780_p3 = pnand %p2469_p1, %p779_p2 }
  0x17   : > { %p889_p4 = scmp.lt.s32.totalorder (!%p780_p3), %s2890_s5, 1  ;;  %s3499_s27 = sld [smem:[#allocation18_spill]] (!%p780_p3) }
  0x18   : > { %783 = sbr.rel (%p780_p3) target bundleno = 4167 (0x1047), region = 116  ;;  %s3500_s9 = sld [smem:[#allocation20_spill]] (!%p780_p3) }
  0x19   : > { %p2478_p5 = scmp.ne.s32.totalorder (!%p780_p3), %s2890_s5, 0 }
  0x1f   : > { %s3060_s2 = scalar_select %p889_p4, %s2890_s5, 1 }
  0x20   : > { %937 = sbr.rel (%p2478_p5) target bundleno = 606 (0x25e), region = 120  ;;  %s3501_s29 = sld [smem:[#allocation15_spill]] (!%p2478_p5)  ;;  %vm1117_vm0 = vcmask (!%p2478_p5), 261120  }
  0x21   : > { %s2549_s1 = sshll.u32 %s3060_s2, 4  ;;  %s913_s4 = scalar_lea.vmem %s3457_s11, %s3060_s2 }
  0x22   : > { %s3078_s23 = scalar_lea.vmem %s3499_s27, %s2549_s1  ;;  %s3083_s20 = scalar_lea.vmem %s3500_s9, %s2549_s1 }
  0x23   : > { %s916_s6 = scalar_lea.vmem %s3458_s12, %s3060_s2  ;;  %s3100_s0 = scalar_lea.vmem %s3459_s13, %s2549_s1 }
  0x24   : > { %s924_s24 = scalar_lea.vmem %s3460_s14, %s3060_s2  ;;  %s2552_s9 = sshll.u32 %s3060_s2, 6 }
  0x25   : > { %s3110_s3 = scalar_lea.vmem %s3461_s15, %s2552_s9  ;;  %s3502_s28 = sld [smem:[#allocation11_spill]] (!%p2478_p5) }
  0x26   : > { %v2773_v0 = vld [vmem:[%s3501_s29 + $0x40] sm:$0xff] (!%p2478_p5)   ;;  %v2775_v2 = vld [vmem:[%s3501_s29 + $0x48] sm:$0xff] (!%p2478_p5)   ;;  %v2777_v4 = vld [vmem:[%s3501_s29 + $0x50] sm:$0xff] (!%p2478_p5)   ;;  %s3503_s27 = sld [smem:[#allocation12_spill]] (!%p2478_p5)  ;;  %s3505_s25 = sld [smem:[#allocation13_spill]] (!%p2478_p5) }
  0x27   : > { %v2774_v1 = vld [vmem:[%s3501_s29] sm:$0xff]   ;;  %2553 = vmatprep.subr.bf16.mxu0 %v2773_v0  ;;  %v2776_v3 = vld [vmem:[%s3501_s29 + $0x8] sm:$0xff]   ;;  %v2778_v5 = vld [vmem:[%s3501_s29 + $0x10] sm:$0xff]   ;;  %s3506_s1 = sld [smem:[#allocation14_spill]] }
  0x28   : > { %2554 = vmatpush3.bf16.msra.mxu0 %v2774_v1  ;;  %v2779_v6 = vld [vmem:[%s3501_s29 + $0x58] sm:$0xff]   ;;  %v2781_v8 = vld [vmem:[%s3501_s29 + $0x60] sm:$0xff]   ;;  %v2783_v10 = vld [vmem:[%s3501_s29 + $0x68] sm:$0xff]  }
  0x29   : > { %2555 = vmatprep.subr.bf16.mxu0 %v2775_v2  ;;  %v2780_v7 = vld [vmem:[%s3501_s29 + $0x18] sm:$0xff]   ;;  %v2782_v9 = vld [vmem:[%s3501_s29 + $0x20] sm:$0xff]   ;;  %v2784_v14 = vld [vmem:[%s3501_s29 + $0x28] sm:$0xff]  }
  0x2a   : > { %v2785_v15 = vld [vmem:[%s3501_s29 + $0x70] sm:$0xff]   ;;  %v2787_v17 = vld [vmem:[%s3501_s29 + $0x78] sm:$0xff]  }
  0x2b   : > { %v939_v11 = vld [vmem:[%s3502_s28 + $0x8] sm:$0xff]  ;;  %v941_v12 = vld [vmem:[%s3502_s28 + $0x18] sm:$0xff]  ;;  %v2786_v16 = vld [vmem:[%s3501_s29 + $0x30] sm:$0xff]  }
  0x2c   : > { %2556 = vmatpush3.bf16.msra.mxu0 %v2776_v3  ;;  %v943_v13 = vpack.c.bf16 %v941_v12, %v939_v11  ;;  %v2788_v18 = vld [vmem:[%s3501_s29 + $0x38] sm:$0xff]   ;;  %v938_v19 = vld [vmem:[%s3502_s28] sm:$0xff]  ;;  %v940_v20 = vld [vmem:[%s3502_s28 + $0x10] sm:$0xff]  ;;  %s3504_s21 = smov %s3503_s27 }
  0x2d   : > { %2557 = vmatprep.subr.bf16.mxu0 %v2777_v4  ;;  %v942_v21 = vpack.c.bf16 %v940_v20, %v938_v19  ;;  %v976_v24 = vld [vmem:[%s3503_s27] sm:$0xff]  ;;  %v977_v28 = vld [vmem:[%s3504_s21 + $0x8] sm:$0xff] }
  0x2e   : > { %1106 = vmatprep.mubr.bf16.mxu0 %v943_v13  ;;  %v2495_v51 = vld [vmem:[%s3505_s25] ss:$0 sm:$0xff] }
  0x2f   : > { %v2496_v53 = vld [vmem:[%s3506_s1] ss:$0 sm:$0xff] }
  0x30   : > { %2558 = vmatpush3.bf16.msra.mxu0 %v2778_v5 }
  0x31   : > { %2559 = vmatprep.subr.bf16.mxu0 %v2779_v6 }
  0x34   : > { %2560 = vmatpush3.bf16.msra.mxu0 %v2780_v7 }
  0x35   : > { %2561 = vmatprep.subr.bf16.mxu0 %v2781_v8 }
  0x38   : > { %2562 = vmatpush3.bf16.msra.mxu0 %v2782_v9 }
  0x39   : > { %2563 = vmatprep.subr.bf16.mxu0 %v2783_v10 }
  0x3c   : > { %2564 = vmatpush3.bf16.msra.mxu0 %v2784_v14 }
  0x3d   : > { %2565 = vmatprep.subr.bf16.mxu0 %v2785_v15 }
  0x40   : > { %2566 = vmatpush3.bf16.msra.mxu0 %v2786_v16 }
  0x41   : > { %2567 = vmatprep.subr.bf16.mxu0 %v2787_v17 }
  0x44   : > { %2568 = vmatpush3.bf16.msra.mxu0 %v2788_v18 }
  0x47   : > { %1107 = vmatmul.mubr.bf16.vlgmr.msra.gmra.mrb[0].mxu0 %v942_v21 }
 0x11a   : > { %v2569_v22 = vpop.f32.mrb[0].mxu0 }
 0x11b   : > { %v2570_v23 = vpop.f32.mrb[1].mxu0 }
 0x11c   : > { %v2571_v25 = vadd.f32 %v2570_v23, %v2569_v22  ;;  %v2572_v26 = vpop.f32.mrb[2].mxu0 }
 0x11d   : > { %v2573_v27 = vpop.f32.mrb[3].mxu0 }
 0x11e   : > { %v2574_v29 = vadd.f32 %v2573_v27, %v2572_v26  ;;  %v1109_v30 = vadd.f32 %v2571_v25, %v976_v24 }
 0x120   : > { %v1118_v31 = vsel %vm1117_vm0, %v1109_v30, 0.0  ;;  %v1112_v32 = vadd.f32 %v2574_v29, %v977_v28 }
 0x121   : > { %1119 = vadd.xlane.f32.xlu0 %v1118_v31 }
 0x122   : > { %v1121_v33 = vsel %vm1117_vm0, %v1112_v32, 0.0 }
 0x125   : > { %1122 = vadd.xlane.f32.xlu0 %v1121_v33 }
 0x1ae   : > { %v1120_v34 = vpop.xlane.xlu0 %1119 }
 0x1af   : > { %v1125_v35 = vmul.f32 0.03125, %v1120_v34 }
 0x1b1   : > { %v1127_v36 = vsub.f32 %v1109_v30, %v1125_v35 }
 0x1b2   : > { %v1123_v37 = vpop.xlane.xlu0 %1122 }
 0x1b3   : > { %v1126_v38 = vmul.f32 0.03125, %v1123_v37  ;;  %v1129_v39 = vmul.f32 %v1127_v36, %v1127_v36 }
 0x1b5   : > { %v1128_v40 = vsub.f32 %v1112_v32, %v1126_v38  ;;  %v1131_v41 = vsel %vm1117_vm0, %v1129_v39, 0.0 }
 0x1b6   : > { %1132 = vadd.xlane.f32.xlu1 %v1131_v41 }
 0x1b7   : > { %v1130_v42 = vmul.f32 %v1128_v40, %v1128_v40 }
 0x1b9   : > { %v1134_v43 = vsel %vm1117_vm0, %v1130_v42, 0.0 }
 0x1ba   : > { %1135 = vadd.xlane.f32.xlu1 %v1134_v43 }
 0x243   : > { %v1133_v44 = vpop.xlane.xlu1 %1132 }
 0x244   : > { %v1137_v45 = vmul.f32 0.03125, %v1133_v44 }
 0x246   : > { %v1139_v46 = vadd.f32 1e-05, %v1137_v45 }
 0x247   : > { %v1136_v47 = vpop.xlane.xlu1 %1135 }
 0x248   : > { %2789 = vrsqrt.f32 %v1139_v46  ;;  %v1138_v48 = vmul.f32 0.03125, %v1136_v47 }
 0x24a   : > { %v1140_v49 = vadd.f32 1e-05, %v1138_v48 }
 0x24c   : > { %2791 = vrsqrt.f32 %v1140_v49 }
 0x252   : > { %v2790_v50 = vpop.eup %2789 }
 0x253   : > { %v1143_v52 = vmul.f32 %v2790_v50, %v1127_v36 }
 0x255   : > { %v1151_v54 = vmul.f32 %v2495_v51, %v1143_v52 }
 0x256   : > { %v2792_v55 = vpop.eup %2791 }
 0x257   : > { %v1159_v56 = vadd.f32 %v2496_v53, %v1151_v54  ;;  %v1144_v57 = vmul.f32 %v2792_v55, %v1128_v40 }
 0x259   : > { %1161 = vst.msk [vmem:[#allocation2] sm:$0xff] %vm1117_vm0, %v1159_v56  ;;  %v1152_v58 = vmul.f32 %v2495_v51, %v1144_v57 }
 0x25b   : > { %v1160_v59 = vadd.f32 %v2496_v53, %v1152_v58 }
 0x25d   : > { %1162 = vst.msk [vmem:[#allocation2 + $0x8] sm:$0xff] %vm1117_vm0, %v1160_v59 }
 0x25e PF: > { %vm1167_vm1 = vcmask 261120   ;;  %v2793_v10 = vld [vmem:[%s3078_s23] sm:$0xff]   ;;  %v2900_v11 = vmov 0.0   ;;  %v2794_v12 = vld [vmem:[%s3078_s23 + $0x8] sm:$0xff]   ;;  %vm2901_vm2 = vmmov 0   ;;  %s3507_s22 = sld [smem:[#allocation16_spill]]  ;;  %s3513_s1 = scalar_lea.vmem %s3456_s10, %s3060_s2 }
 0x25f   : > { %2617 = vmatprep.subr.bf16.mxu0 %v2900_v11  ;;  %2637 = vmatprep.subr.bf16.mxu1 %v2900_v11  ;;  %s3509_s25 = sld [smem:[#allocation17_spill]]  ;;  %s3511_s23 = sld [smem:[#allocation19_spill]]  ;;  %vm1283_vm3 = vcmask 130048   ;;  %vm1330_vm4 = vcmask 39936   ;;  %vm1348_vm5 = vcmask 1041408   ;;  %vm1349_vm6 = vcmask 1042432  }
 0x260   : > { %v3195_v60 = vld [vmem:[#allocation2] sm:$0xff]  ;;  %2618 = vmatpush3.bf16.msra.mxu0 %v2793_v10  ;;  %2621 = vmatprep.mubr.msk.bf16.mxu0 %vm2901_vm2, %v2900_v11  ;;  %s2904_s9 = smov 112   ;;  %s2905_s7 = smov 64   ;;  %vm1510_vm7 = vcmask 261248  }
 0x261   : > { %v1168_v62 = vsel %vm1167_vm1, %v3195_v60, 0.0  ;;  %2619 = vmatprep.subr.bf16.mxu0 %v2900_v11  ;;  %2639 = vmatprep.mubr.msk.bf16.mxu1 %vm2901_vm2, %v2900_v11  ;;  %p2532_p6 = scmp.ne.s32.totalorder %s2890_s5, 1 }
 0x262   : > { %1169 = vadd.xlane.f32.xlu0 %v1168_v62  ;;  %vm2060_vm8 = vcmask (!%p2532_p6), 253952   ;;  %vm2066_vm9 = vcmask (!%p2532_p6), 254976   ;;  %vm2910_vm10 = vmmov (!%p2532_p6), 0   ;;  %vm2281_vm11 = vcmask (!%p2532_p6), 25600  }
 0x264   : > { %v3197_v61 = vld [vmem:[#allocation2 + $0x8] sm:$0xff]  ;;  %2620 = vmatpush3.bf16.msra.mxu0 %v2794_v12  ;;  %s3508_s30 = scalar_lea.vmem %s3507_s22, %s3060_s2  ;;  %s2902_s22 = smov 80  }
 0x265   : > { %v1171_v63 = vsel %vm1167_vm1, %v3197_v61, 0.0  ;;  %2625 = vmatprep.subr.bf16.mxu0 %v2900_v11  ;;  %v2497_v21 = vld [vmem:[%s3508_s30] ss:$0 sm:$0xff]  ;;  %s3510_s8 = scalar_lea.vmem %s3509_s25, %s3060_s2  ;;  %s3512_s27 = scalar_lea.vmem %s3511_s23, %s3060_s2 }
 0x266   : > { %1172 = vadd.xlane.f32.xlu0 %v1171_v63  ;;  %v2498_v25 = vld [vmem:[%s3510_s8] ss:$0 sm:$0xff]  ;;  %s2903_s30 = smov 96   ;;  %s2907_s25 = smov 48  }
 0x267   : > { %v2499_v30 = vld [vmem:[%s3512_s27] ss:$0 sm:$0xff]  ;;  %s2908_s8 = smov 16   ;;  %s3515_s27 = sld [smem:[#allocation21_spill]] (!%p2532_p6) }
 0x2ef   : > { %v1170_v0 = vpop.xlane.xlu0 %1169 }
 0x2f0   : > { %v1175_v1 = vmul.f32 0.03125, %v1170_v0 }
 0x2f2   : > { %v1177_v2 = vsub.f32 %v3195_v60, %v1175_v1 }
 0x2f3   : > { %v1173_v3 = vpop.xlane.xlu0 %1172 }
 0x2f4   : > { %v1176_v4 = vmul.f32 0.03125, %v1173_v3  ;;  %v1179_v5 = vmul.f32 %v1177_v2, %v1177_v2 }
 0x2f6   : > { %v1178_v6 = vsub.f32 %v3197_v61, %v1176_v4  ;;  %v1181_v7 = vsel %vm1167_vm1, %v1179_v5, 0.0 }
 0x2f7   : > { %1182 = vadd.xlane.f32.xlu1 %v1181_v7  ;;  %v2906_v7 = vmov 65535  }
 0x2f8   : > { %v1180_v8 = vmul.f32 %v1178_v6, %v1178_v6 }
 0x2fa   : > { %v1184_v9 = vsel %vm1167_vm1, %v1180_v8, 0.0  ;;  %v1350_v8 = vsel %vm1348_vm5, 4294967295, %v2906_v7 }
 0x2fb   : > { %1185 = vadd.xlane.f32.xlu1 %v1184_v9 }
 0x384   : > { %v1183_v13 = vpop.xlane.xlu1 %1182 }
 0x385   : > { %v1187_v14 = vmul.f32 0.03125, %v1183_v13 }
 0x387   : > { %v1189_v15 = vadd.f32 1e-05, %v1187_v14  ;;  %v3274_v14 = vsel %vm1349_vm6, %v1350_v8, 0 }
 0x388   : > { %v1186_v16 = vpop.xlane.xlu1 %1185 }
 0x389   : > { %2807 = vrsqrt.f32 %v1189_v15  ;;  %v1188_v17 = vmul.f32 0.03125, %v1186_v16 }
 0x38b   : > { %v1190_v18 = vadd.f32 1e-05, %v1188_v17 }
 0x38d   : > { %2809 = vrsqrt.f32 %v1190_v18 }
 0x393   : > { %v2808_v19 = vpop.eup %2807 }
 0x394   : > { %v1193_v20 = vmul.f32 %v2808_v19, %v1177_v2 }
 0x396   : > { %v1201_v24 = vmul.f32 %v2497_v21, %v1193_v20 }
 0x397   : > { %v2810_v22 = vpop.eup %2809 }
 0x398   : > { %v1194_v23 = vmul.f32 %v2810_v22, %v1178_v6  ;;  %v1209_v27 = vadd.f32 %v2498_v25, %v1201_v24 }
 0x39a   : > { %v1202_v26 = vmul.f32 %v2497_v21, %v1194_v23 }
 0x39c   : > { %v1210_v28 = vadd.f32 %v2498_v25, %v1202_v26 }
 0x39e   : > { %v1211_v29 = vpack.c.bf16 %v1210_v28, %v1209_v27 }
 0x3a0   : > { %2622 = vmatmul.mubr.msk.bf16.vlgmr.msra.gmra.mrb[0].mxu0 %vm1167_vm1, %v1211_v29 }
 0x3a1   : > { %2627 = vmatprep.mubr.msk.bf16.mxu0 %vm2901_vm2, %v2900_v11 }
 0x473   : > { %v1272_v31 = vpop.f32.mrb[0].mxu0 }
 0x474   : > { %v2623_v32 = vpop.f32.mrb[1].mxu0  ;;  %v1273_v34 = vadd.f32 %v2499_v30, %v1272_v31 }
 0x475   : > { %v1275_v33 = vpop.f32.mrb[2].mxu0 }
 0x476   : > { %v1276_v35 = vadd.f32 %v2499_v30, %v1275_v33  ;;  %v2624_v36 = vpop.f32.mrb[3].mxu0 }
 0x478   : > { %v3235_v37 = vpack.c.bf16 %v1276_v35, %v1273_v34 }
 0x47a   : > { %1398 = vrot.lane.b32.xlu1 %v3235_v37, %s2902_s22  ;;  %1281 = vrot.lane.b32.xlu0 %v3235_v37, %s2903_s30  ;;  %v3240_v38 = vrot.slane %v3235_v37, 4 }
 0x47e   : > { %1396 = vrot.lane.b32.xlu1 %v3235_v37, %s2904_s9  ;;  %1624 = vrot.lane.b32.xlu0 %v3240_v38, %s2902_s22 }
 0x482   : > { %1513 = vrot.lane.b32.xlu1 %v3240_v38, %s2903_s30  ;;  %s3514_s30 = scalar_lea.vmem %s3462_s16, %s3060_s2  ;;  %s3517_s2 = sld [smem:[#allocation22_spill]] (!%p2532_p6) }
 0x486   : > { %1622 = vrot.lane.b32.xlu1 %v3240_v38, %s2904_s9 }
 0x4ec   : > { %v1399_v39 = vpop.permute.xlu1 %1398  ;;  %v1282_v40 = vpop.permute.xlu0 %1281 }
 0x4ed   : > { %v1288_v41 = vsel %vm1283_vm3, %v1282_v40, 0  ;;  %v1404_v42 = vsel %vm1283_vm3, %v1399_v39, 0 }
 0x4ee   : > { %2626 = vmatpush3.bf16.xpose.msra.mxu0 %v1288_v41  ;;  %2638 = vmatpush3.bf16.xpose.msra.mxu1 %v1404_v42 }
 0x4ef   : > { %2649 = vmatprep.subr.bf16.mxu1 %v2900_v11  ;;  %2631 = vmatprep.subr.bf16.mxu0 %v2900_v11 }
 0x4f0   : > { %v1397_v43 = vpop.permute.xlu1 %1396  ;;  %v1625_v46 = vpop.permute.xlu0 %1624 }
 0x4f1   : > { %v1630_v47 = vsel %vm1283_vm3, %v1625_v46, 0 }
 0x4f4   : > { %v1514_v44 = vpop.permute.xlu1 %1513 }
 0x4f5   : > { %v1519_v45 = vsel %vm1283_vm3, %v1514_v44, 0  ;;  %2628 = vmatmul.mubr.msk.bf16.vlgmr.msra.gmra.mrb[4].mxu0 %vm1283_vm3, %v3235_v37  ;;  %2640 = vmatmul.mubr.msk.bf16.vlgmr.msra.gmra.mrb[0].mxu1 %vm1283_vm3, %v1397_v43 }
 0x4f6   : > { %2650 = vmatpush3.bf16.xpose.msra.mxu1 %v1519_v45  ;;  %2651 = vmatprep.mubr.msk.bf16.mxu1 %vm2901_vm2, %v2900_v11 }
 0x4f7   : > { %2661 = vmatprep.subr.bf16.mxu1 %v2900_v11  ;;  %2633 = vmatprep.mubr.msk.bf16.mxu0 %vm2901_vm2, %v2900_v11 }
 0x4f8   : > { %v1623_v48 = vpop.permute.xlu1 %1622 }
 0x4fd   : > { %2652 = vmatmul.mubr.msk.bf16.vlgmr.msra.gmra.mrb[4].mxu1 %vm1283_vm3, %v3240_v38 }
 0x4fe   : > { %2662 = vmatpush3.bf16.xpose.msra.mxu1 %v1630_v47  ;;  %2663 = vmatprep.mubr.msk.bf16.mxu1 %vm2901_vm2, %v2900_v11 }
 0x4ff   : > { %2673 = vmatprep.subr.bf16.mxu1 %v2900_v11 }
 0x505   : > { %2664 = vmatmul.mubr.msk.bf16.vlgmr.msra.gmra.mrb[8].mxu1 %vm1283_vm3, %v1623_v48 }
 0x506   : > { %2677 = vmatprep.mubr.msk.bf16.mxu1 %vm2901_vm2, %v2900_v11 }
 0x5c8   : > { %v1324_v49 = vpop.f32.mrb[4].mxu0  ;;  %v1440_v50 = vpop.f32.mrb[0].mxu1 }
 0x5c9   : > { %v2629_v51 = vpop.f32.mrb[5].mxu0  ;;  %v2641_v52 = vpop.f32.mrb[1].mxu1  ;;  %v1446_v53 = vsel %vm1330_vm4, %v1440_v50, -inf  ;;  %v1331_v54 = vsel %vm1330_vm4, %v1324_v49, -inf }
 0x5ca   : > { %v1443_v55 = vpop.f32.mrb[2].mxu1  ;;  %1447 = vmax.xlane.f32.xlu1 %v1446_v53  ;;  %1332 = vmax.xlane.f32.xlu0 %v1331_v54  ;;  %v1327_v56 = vpop.f32.mrb[6].mxu0 }
 0x5cb   : > { %v2630_v57 = vpop.f32.mrb[7].mxu0  ;;  %v2642_v58 = vpop.f32.mrb[3].mxu1 }
 0x5d0   : > { %v1555_v59 = vpop.f32.mrb[4].mxu1 }
 0x5d1   : > { %v2653_v62 = vpop.f32.mrb[5].mxu1  ;;  %v1561_v63 = vsel %vm1330_vm4, %v1555_v59, -inf }
 0x5d2   : > { %v1558_v0 = vpop.f32.mrb[6].mxu1  ;;  %1562 = vmax.xlane.f32.xlu0 %v1561_v63 }
 0x5d3   : > { %v2654_v1 = vpop.f32.mrb[7].mxu1 }
 0x5d4   : > { %v2795_v1 = vld [vmem:[%s3083_s20] sm:$0xff]  }
 0x5d5   : > { %2674 = vmatpush3.bf16.msra.mxu1 %v2795_v1  ;;  %v2517_v1 = vld [vmem:[%s924_s24] ss:$0 sm:$0xff] }
 0x5d6   : > { %2675 = vmatprep.subr.bf16.mxu1 %v2900_v11 }
 0x5d8   : > { %v1666_v2 = vpop.f32.mrb[8].mxu1 }
 0x5d9   : > { %v2665_v3 = vpop.f32.mrb[9].mxu1  ;;  %v1672_v4 = vsel %vm1330_vm4, %v1666_v2, -inf }
 0x5da   : > { %v1669_v5 = vpop.f32.mrb[10].mxu1  ;;  %1673 = vmax.xlane.f32.xlu0 %v1672_v4 }
 0x5db   : > { %1343 = vrot.lane.b32.xlu1 %v3235_v37, %s2905_s7  ;;  %v2666_v6 = vpop.f32.mrb[11].mxu1 }
 0x657   : > { %v1448_v9 = vpop.xlane.xlu1 %1447  ;;  %v1333_v10 = vpop.xlane.xlu0 %1332 }
 0x658   : > { %v1449_v12 = vsub.f32 %v1440_v50, %v1448_v9  ;;  %v1334_v13 = vsub.f32 %v1324_v49, %v1333_v10 }
 0x65a   : > { %v1450_v15 = vmul.f32 1.442695, %v1449_v12  ;;  %v1335_v16 = vmul.f32 1.442695, %v1334_v13 }
 0x65b   : > { %v1344_v17 = vpop.permute.xlu1 %1343 }
 0x65c   : > { %2811 = vpow2.f32 %v1450_v15  ;;  %v1353_v18 = vand.u32 %v3274_v14, %v1344_v17  ;;  %v2511_v17 = vld [vmem:[%s3513_s1] ss:$0 sm:$0xff] }
 0x65d   : > { %2813 = vpow2.f32 %v1335_v16 }
 0x65e   : > { %2632 = vmatpush3.bf16.msra.mxu0 %v1353_v18 }
 0x65f   : > { %v1563_v19 = vpop.xlane.xlu0 %1562  ;;  %2643 = vmatprep.subr.bf16.mxu0 %v2900_v11 }
 0x660   : > { %v1564_v20 = vsub.f32 %v1555_v59, %v1563_v19 }
 0x662   : > { %v1565_v21 = vmul.f32 1.442695, %v1564_v20 }
 0x664   : > { %2815 = vpow2.f32 %v1565_v21 }
 0x666   : > { %v2812_v22 = vpop.eup %2811 }
 0x667   : > { %v2814_v23 = vpop.eup %2813  ;;  %v1674_v24 = vpop.xlane.xlu0 %1673  ;;  %v1452_v25 = vsel %vm1330_vm4, %v2812_v22, 0.0 }
 0x668   : > { %v1675_v26 = vsub.f32 %v1666_v2, %v1674_v24  ;;  %1453 = vadd.xlane.f32.xlu1 %v1452_v25  ;;  %v1337_v27 = vsel %vm1330_vm4, %v2814_v23, 0.0  ;;  %v2796_v2 = vld [vmem:[%s3083_s20 + $0x8] sm:$0xff]  }
 0x669   : > { %1338 = vadd.xlane.f32.xlu0 %v1337_v27  ;;  %2676 = vmatpush3.bf16.msra.mxu1 %v2796_v2 }
 0x66a   : > { %v1676_v28 = vmul.f32 1.442695, %v1675_v26  ;;  %2689 = vmatprep.subr.bf16.mxu1 %v2900_v11 }
 0x66c   : > { %2817 = vpow2.f32 %v1676_v28 }
 0x66e   : > { %v2816_v29 = vpop.eup %2815 }
 0x66f   : > { %v1567_v30 = vsel %vm1330_vm4, %v2816_v29, 0.0 }
 0x670   : > { %1568 = vadd.xlane.f32.xlu0 %v1567_v30 }
 0x676   : > { %v2818_v31 = vpop.eup %2817 }
 0x677   : > { %v1678_v32 = vsel %vm1330_vm4, %v2818_v31, 0.0 }
 0x678   : > { %1679 = vadd.xlane.f32.xlu0 %v1678_v32 }
 0x679   : > { %1573 = vrot.lane.b32.xlu1 %v3240_v38, %s2905_s7  ;;  %s3518_s7 = sld [smem:[#allocation24_spill]] (!%p2532_p6) }
 0x67d   : > { %1684 = vrot.lane.b32.xlu1 %v3240_v38, %s2907_s25 }
 0x68e   : > { %1458 = vrot.lane.b32.xlu0 %v3235_v37, %s2907_s25 }
 0x6f5   : > { %v1454_v34 = vpop.xlane.xlu1 %1453 }
 0x6f6   : > { %v1339_v33 = vpop.xlane.xlu0 %1338 }
 0x6f7   : > { %2819 = vrcp.f32 %v1339_v33 }
 0x6f8   : > { %2821 = vrcp.f32 %v1454_v34 }
 0x6f9   : > { %v1574_v44 = vpop.permute.xlu1 %1573 }
 0x6fa   : > { %v1579_v47 = vand.u32 %v1574_v44, %v3274_v14 }
 0x6fd   : > { %v1569_v36 = vpop.xlane.xlu0 %1568  ;;  %v1685_v49 = vpop.permute.xlu1 %1684 }
 0x6fe   : > { %2823 = vrcp.f32 %v1569_v36  ;;  %v1690_v52 = vand.u32 %v1685_v49, %v3274_v14  ;;  %v2797_v36 = vld [vmem:[%s3100_s0] sm:$0xff]  }
 0x701   : > { %v2820_v35 = vpop.eup %2819 }
 0x702   : > { %v1341_v39 = vmul.f32 %v2820_v35, %v2814_v23  ;;  %v2822_v42 = vpop.eup %2821 }
 0x703   : > { %v1456_v43 = vmul.f32 %v2822_v42, %v2812_v22 }
 0x704   : > { %v1342_v40 = vpack.c.bf16 %v1341_v39, %v1341_v39  ;;  %v2798_v39 = vld [vmem:[%s3100_s0 + $0x8] sm:$0xff]  }
 0x705   : > { %v1680_v41 = vpop.xlane.xlu0 %1679  ;;  %v1457_v45 = vpack.c.bf16 %v1456_v43, %v1456_v43 }
 0x706   : > { %2634 = vmatmul.mubr.msk.bf16.vlgmr.msra.gmra.mrb[8].mxu0 %vm1330_vm4, %v1342_v40  ;;  %2825 = vrcp.f32 %v1680_v41 }
 0x707   : > { %2645 = vmatprep.mubr.msk.bf16.mxu0 %vm2901_vm2, %v2900_v11 }
 0x708   : > { %v2824_v46 = vpop.eup %2823 }
 0x709   : > { %v1459_v38 = vpop.permute.xlu0 %1458  ;;  %v1571_v48 = vmul.f32 %v2824_v46, %v2816_v29  ;;  %v2515_v46 = vld [vmem:[%s913_s4] ss:$0 sm:$0xff]  ;;  %s3516_s4 = sld [smem:[#allocation23_spill]] (!%p2532_p6) }
 0x70a   : > { %v1464_v37 = vand.u32 %v1459_v38, %v3274_v14 }
 0x70b   : > { %v1572_v50 = vpack.c.bf16 %v1571_v48, %v1571_v48 }
 0x70c   : > { %2644 = vmatpush3.bf16.msra.mxu0 %v1464_v37 }
 0x70d   : > { %2655 = vmatprep.subr.bf16.mxu0 %v2900_v11 }
 0x70f   : > { %2646 = vmatmul.mubr.msk.bf16.vlgmr.msra.gmra.mrb[12].mxu0 %vm1330_vm4, %v1457_v45 }
 0x710   : > { %2656 = vmatpush3.bf16.msra.mxu0 %v1579_v47  ;;  %2657 = vmatprep.mubr.msk.bf16.mxu0 %vm2901_vm2, %v2900_v11  ;;  %v2826_v51 = vpop.eup %2825 }
 0x711   : > { %2667 = vmatprep.subr.bf16.mxu0 %v2900_v11  ;;  %v1682_v53 = vmul.f32 %v2826_v51, %v2818_v31 }
 0x713   : > { %v1683_v54 = vpack.c.bf16 %v1682_v53, %v1682_v53 }
 0x717   : > { %2658 = vmatmul.mubr.msk.bf16.vlgmr.msra.gmra.mrb[16].mxu0 %vm1330_vm4, %v1572_v50  ;;  %v2516_v50 = vld [vmem:[%s916_s6] ss:$0 sm:$0xff] }
 0x718   : > { %2668 = vmatpush3.bf16.msra.mxu0 %v1690_v52  ;;  %2669 = vmatprep.mubr.msk.bf16.mxu0 %vm2901_vm2, %v2900_v11 }
 0x719   : > { %2681 = vmatprep.subr.bf16.mxu0 %v2900_v11 }
 0x71f   : > { %2670 = vmatmul.mubr.msk.bf16.vlgmr.msra.gmra.mrb[20].mxu0 %vm1330_vm4, %v1683_v54 }
 0x720   : > { %2685 = vmatprep.mubr.msk.bf16.mxu0 %vm2901_vm2, %v2900_v11  ;;  %2682 = vmatpush3.bf16.msra.mxu0 %v2797_v36  ;;  %v2909_v36 = vmov (!%p2532_p6), 0.0  }
 0x721   : > { %2683 = vmatprep.subr.bf16.mxu0 %v2900_v11 }
 0x724   : > { %2684 = vmatpush3.bf16.msra.mxu0 %v2798_v39  ;;  %v2840_v39 = vld [vmem:[%s3465_s19 + $0x8] sm:$0xff] (!%p2532_p6)  }
 0x725   : > { %2709 = vmatprep.subr.bf16.mxu0 (!%p2532_p6), %v2909_v36 }
 0x7d9   : > { %v1389_v55 = vpop.f32.mrb[8].mxu0 }
 0x7da   : > { %1395 = vst.msk [vmem:[#allocation3] sm:$0xff] %vm1283_vm3, %v1389_v55  ;;  %v2635_v56 = vpop.f32.mrb[9].mxu0  ;;  %v2799_v55 = vld [vmem:[%s3110_s3] sm:$0xff]  }
 0x7db   : > { %v1392_v57 = vpop.f32.mrb[10].mxu0  ;;  %v2800_v56 = vld [vmem:[%s3110_s3 + $0x8] sm:$0xff]  }
 0x7dc   : > { %v2636_v58 = vpop.f32.mrb[11].mxu0  ;;  %v2801_v57 = vld [vmem:[%s3110_s3 + $0x10] sm:$0xff]  }
 0x7dd   : > { %v2802_v58 = vld [vmem:[%s3110_s3 + $0x18] sm:$0xff]  }
 0x7e2   : > { %v1500_v59 = vpop.f32.mrb[12].mxu0 }
 0x7e3   : > { %1507 = vrot.lane.b32.xlu1 %v1500_v59, %s2908_s8  ;;  %v2647_v62 = vpop.f32.mrb[13].mxu0  ;;  %v2803_v59 = vld [vmem:[%s3110_s3 + $0x20] sm:$0xff]  }
 0x7e4   : > { %v1503_v63 = vpop.f32.mrb[14].mxu0  ;;  %v2804_v62 = vld [vmem:[%s3110_s3 + $0x28] sm:$0xff]  }
 0x7e5   : > { %v2648_v0 = vpop.f32.mrb[15].mxu0  ;;  %v2805_v63 = vld [vmem:[%s3110_s3 + $0x30] sm:$0xff]  }
 0x7e6   : > { %v2806_v0 = vld [vmem:[%s3110_s3 + $0x38] sm:$0xff]  }
 0x7ea   : > { %v1615_v3 = vpop.f32.mrb[16].mxu0 }
 0x7eb   : > { %1621 = vst.msk [vmem:[#allocation3 + $0x8] sm:$0xff] %vm1283_vm3, %v1615_v3  ;;  %v2659_v4 = vpop.f32.mrb[17].mxu0 }
 0x7ec   : > { %v1618_v5 = vpop.f32.mrb[18].mxu0 }
 0x7ed   : > { %v2660_v6 = vpop.f32.mrb[19].mxu0 }
 0x7f2   : > { %v1726_v7 = vpop.f32.mrb[20].mxu0 }
 0x7f3   : > { %1733 = vrot.lane.b32.xlu1 %v1726_v7, %s2908_s8  ;;  %v2671_v8 = vpop.f32.mrb[21].mxu0 }
 0x7f4   : > { %v1729_v9 = vpop.f32.mrb[22].mxu0 }
 0x7f5   : > { %v2672_v10 = vpop.f32.mrb[23].mxu0 }
 0x855   : > { %v1508_v12 = vpop.permute.xlu1 %1507 }
 0x856   : > { %1511 = vst.msk [vmem:[#allocation3] sm:$0xff] %vm1510_vm7, %v1508_v12 }
 0x85d   : > { %v1737_v14 = vld [vmem:[#allocation3] sm:$0xff] }
 0x865   : > { %v1734_v13 = vpop.permute.xlu1 %1733 }
 0x866   : > { %1736 = vst.msk [vmem:[#allocation3 + $0x8] sm:$0xff] %vm1510_vm7, %v1734_v13 }
 0x86d   : > { %v1738_v15 = vld [vmem:[#allocation3 + $0x8] sm:$0xff] }
 0x86e   : > { %v1739_v16 = vpack.c.bf16 %v1738_v15, %v1737_v14 }
 0x870   : > { %2678 = vmatmul.mubr.msk.bf16.vlgmr.msra.gmra.mrb[12].mxu1 %vm1167_vm1, %v1739_v16 }
 0x871   : > { %2705 = vmatprep.mubr.msk.bf16.mxu1 %vm2901_vm2, %v2900_v11  ;;  %2690 = vmatpush3.bf16.msra.mxu1 %v2799_v55  ;;  %v2843_v55 = vld [vmem:[%s3516_s4 + $0x8] sm:$0xff] (!%p2532_p6)  }
 0x872   : > { %2691 = vmatprep.subr.bf16.mxu1 %v2900_v11 }
 0x875   : > { %2692 = vmatpush3.bf16.msra.mxu1 %v2800_v56  ;;  %v2538_v56 = vld [vmem:[%s3517_s2] ss:$0 sm:$0xff] (!%p2532_p6) }
 0x876   : > { %2693 = vmatprep.subr.bf16.mxu1 %v2900_v11 }
 0x879   : > { %2694 = vmatpush3.bf16.msra.mxu1 %v2801_v57 }
 0x87a   : > { %2695 = vmatprep.subr.bf16.mxu1 %v2900_v11 }
 0x87d   : > { %2696 = vmatpush3.bf16.msra.mxu1 %v2802_v58 }
 0x87e   : > { %2697 = vmatprep.subr.bf16.mxu1 %v2900_v11 }
 0x881   : > { %2698 = vmatpush3.bf16.msra.mxu1 %v2803_v59 }
 0x882   : > { %2699 = vmatprep.subr.bf16.mxu1 %v2900_v11 }
 0x885   : > { %2700 = vmatpush3.bf16.msra.mxu1 %v2804_v62 }
 0x886   : > { %2701 = vmatprep.subr.bf16.mxu1 %v2900_v11 }
 0x889   : > { %2702 = vmatpush3.bf16.msra.mxu1 %v2805_v63 }
 0x88a   : > { %2703 = vmatprep.subr.bf16.mxu1 %v2900_v11 }
 0x88d   : > { %2704 = vmatpush3.bf16.msra.mxu1 %v2806_v0 }
 0x88e   : > { %2717 = vmatprep.subr.bf16.mxu1 (!%p2532_p6), %v2909_v36 }
 0x943   : > { %v1800_v18 = vpop.f32.mrb[12].mxu1 }
 0x944   : > { %v1801_v19 = vadd.f32 %v2511_v17, %v1800_v18  ;;  %v2679_v20 = vpop.f32.mrb[13].mxu1 }
 0x945   : > { %v1803_v21 = vpop.f32.mrb[14].mxu1 }
 0x946   : > { %v3319_v22 = vadd.f32 %v1801_v19, %v3195_v60  ;;  %v1804_v23 = vadd.f32 %v2511_v17, %v1803_v21  ;;  %v2680_v24 = vpop.f32.mrb[15].mxu1 }
 0x948   : > { %v3322_v25 = vadd.f32 %v1804_v23, %v3197_v61  ;;  %v1811_v26 = vsel %vm1167_vm1, %v3319_v22, 0.0  ;;  %v2531_v23 = vld [vmem:[%s3514_s30] ss:$0 sm:$0xff] }
 0x949   : > { %1812 = vadd.xlane.f32.xlu0 %v1811_v26 }
 0x94a   : > { %v1814_v27 = vsel %vm1167_vm1, %v3322_v25, 0.0 }
 0x94b   : > { %1815 = vadd.xlane.f32.xlu1 %v1814_v27 }
 0x9d6   : > { %v1813_v28 = vpop.xlane.xlu0 %1812 }
 0x9d7   : > { %v1817_v29 = vmul.f32 0.03125, %v1813_v28 }
 0x9d8   : > { %v1816_v30 = vpop.xlane.xlu1 %1815 }
 0x9d9   : > { %v1819_v60 = vsub.f32 %v3319_v22, %v1817_v29  ;;  %v1818_v31 = vmul.f32 0.03125, %v1816_v30 }
 0x9db   : > { %v1820_v32 = vsub.f32 %v3322_v25, %v1818_v31  ;;  %v1821_v61 = vmul.f32 %v1819_v60, %v1819_v60 }
 0x9dd   : > { %v1823_v33 = vsel %vm1167_vm1, %v1821_v61, 0.0  ;;  %v1822_v34 = vmul.f32 %v1820_v32, %v1820_v32 }
 0x9de   : > { %1824 = vadd.xlane.f32.xlu0 %v1823_v33 }
 0x9df   : > { %v1826_v35 = vsel %vm1167_vm1, %v1822_v34, 0.0 }
 0x9e2   : > { %1827 = vadd.xlane.f32.xlu0 %v1826_v35  ;;  %v2839_v35 = vld [vmem:[%s3465_s19] sm:$0xff] (!%p2532_p6)  }
 0xa6b   : > { %v1825_v40 = vpop.xlane.xlu0 %1824 }
 0xa6c   : > { %v1829_v41 = vmul.f32 0.03125, %v1825_v40 }
 0xa6e   : > { %v1831_v42 = vadd.f32 1e-05, %v1829_v41 }
 0xa6f   : > { %v1828_v43 = vpop.xlane.xlu0 %1827 }
 0xa70   : > { %2827 = vrsqrt.f32 %v1831_v42  ;;  %v1830_v38 = vmul.f32 0.03125, %v1828_v43 }
 0xa72   : > { %v1832_v37 = vadd.f32 1e-05, %v1830_v38  ;;  %v2533_v38 = vld [vmem:[%s3463_s17] ss:$0 sm:$0xff] (!%p2532_p6) }
 0xa74   : > { %2829 = vrsqrt.f32 %v1832_v37 }
 0xa7a   : > { %v2828_v44 = vpop.eup %2827 }
 0xa7b   : > { %v1835_v45 = vmul.f32 %v2828_v44, %v1819_v60  ;;  %v2534_v44 = vld [vmem:[%s3464_s18] ss:$0 sm:$0xff] (!%p2532_p6) }
 0xa7d   : > { %v1843_v48 = vmul.f32 %v2515_v46, %v1835_v45 }
 0xa7e   : > { %v2830_v47 = vpop.eup %2829 }
 0xa7f   : > { %v1836_v49 = vmul.f32 %v2830_v47, %v1820_v32  ;;  %v1851_v52 = vadd.f32 %v2516_v50, %v1843_v48  ;;  %v2841_v48 = vld [vmem:[%s3515_s27] sm:$0xff] (!%p2532_p6)  }
 0xa81   : > { %v1844_v51 = vmul.f32 %v2515_v46, %v1836_v49 }
 0xa83   : > { %v1852_v53 = vadd.f32 %v2516_v50, %v1844_v51  ;;  %v2842_v50 = vld [vmem:[%s3516_s4] sm:$0xff] (!%p2532_p6)  }
 0xa85   : > { %v1853_v54 = vpack.c.bf16 %v1852_v53, %v1851_v52 }
 0xa87   : > { %2686 = vmatmul.mubr.msk.bf16.vlgmr.msra.gmra.mrb[24].mxu0 %vm1167_vm1, %v1853_v54 }
 0xa88   : > { %2713 = vmatprep.mubr.msk.bf16.mxu0 (!%p2532_p6), %vm2910_vm10, %v2909_v36  ;;  %2710 = vmatpush3.bf16.msra.mxu0 (!%p2532_p6), %v2839_v35 }
 0xa89   : > { %2711 = vmatprep.subr.bf16.mxu0 (!%p2532_p6), %v2909_v36 }
 0xa8c   : > { %2712 = vmatpush3.bf16.msra.mxu0 (!%p2532_p6), %v2840_v39 }
 0xb5a   : > { %v1914_v2 = vpop.f32.mrb[24].mxu0 }
 0xb5b   : > { %v1915_v3 = vadd.f32 %v2517_v1, %v1914_v2  ;;  %v2687_v4 = vpop.f32.mrb[25].mxu0  ;;  %v2541_v2 = vld [vmem:[%s3518_s7] ss:$0 sm:$0xff] (!%p2532_p6) }
 0xb5c   : > { %v1917_v5 = vpop.f32.mrb[26].mxu0 }
 0xb5d   : > { %v2521_v6 = vmul.f32 -1.702, %v1915_v3  ;;  %v1918_v7 = vadd.f32 %v2517_v1, %v1917_v5  ;;  %v2688_v8 = vpop.f32.mrb[27].mxu0 }
 0xb5f   : > { %v1925_v9 = vmul.f32 1.442695, %v2521_v6  ;;  %v2522_v10 = vmul.f32 -1.702, %v1918_v7 }
 0xb61   : > { %2831 = vpow2.f32 %v1925_v9  ;;  %v1927_v12 = vmul.f32 1.442695, %v2522_v10 }
 0xb63   : > { %2833 = vpow2.f32 %v1927_v12 }
 0xb6b   : > { %v2832_v11 = vpop.eup %2831 }
 0xb6c   : > { %v1929_v13 = vadd.f32 1.0, %v2832_v11 }
 0xb6d   : > { %v2834_v14 = vpop.eup %2833 }
 0xb6e   : > { %2835 = vrcp.f32 %v1929_v13  ;;  %v1930_v15 = vadd.f32 1.0, %v2834_v14 }
 0xb70   : > { %2837 = vrcp.f32 %v1930_v15 }
 0xb78   : > { %v2836_v16 = vpop.eup %2835 }
 0xb79   : > { %v1935_v18 = vmul.f32 %v2836_v16, %v1915_v3 }
 0xb7a   : > { %v2838_v17 = vpop.eup %2837 }
 0xb7b   : > { %v1936_v19 = vmul.f32 %v2838_v17, %v1918_v7 }
 0xb7d   : > { %v1937_v20 = vpack.c.bf16 %v1936_v19, %v1935_v18 }
 0xb7f   : > { %2706 = vmatmul.mubr.bf16.vlgmr.msra.gmra.mrb[16].mxu1 %v1937_v20 }
 0xb80   : > { %2719 = vmatprep.mubr.msk.bf16.mxu1 (!%p2532_p6), %vm2910_vm10, %v2909_v36  ;;  %2718 = vmatpush3.bf16.msra.mxu1 (!%p2532_p6), %v2841_v48 }
 0xb81   : > { %2723 = vmatprep.subr.bf16.mxu1 (!%p2532_p6), %v2909_v36 }
 0xc52   : > { %v2036_v21 = vpop.f32.mrb[16].mxu1 }
 0xc53   : > { %v2043_v24 = vadd.f32 %v2036_v21, %v3319_v22  ;;  %v2707_v26 = vpop.f32.mrb[17].mxu1  ;;  %2059 = sbr.rel (%p2532_p6) target bundleno = 4132 (0x1024), region = 124 }
 0xc54   : > { %v2039_v27 = vpop.f32.mrb[18].mxu1 }
 0xc55   : > { %v2052_v28 = vadd.f32 %v2531_v23, %v2043_v24  ;;  %v2044_v29 = vadd.f32 %v2039_v27, %v3322_v25  ;;  %v2708_v30 = vpop.f32.mrb[19].mxu1 }
 0xc57   : > { %2054 = vst.msk [vmem:[#allocation2] sm:$0xff] %vm1167_vm1, %v2052_v28  ;;  %v2053_v60 = vadd.f32 %v2531_v23, %v2044_v29 }
 0xc58   : > { %2061 = vst.msk [vmem:[#allocation4] sm:$0x1] (!%p2532_p6), %vm2060_vm8, %v2052_v28 }
 0xc59   : > { %2055 = vst.msk [vmem:[#allocation2 + $0x8] sm:$0xff] %vm1167_vm1, %v2053_v60 }
 0xc5a   : > { %2062 = vst.msk [vmem:[#allocation4 + $0x1] sm:$0x1] %vm2060_vm8, %v2053_v60 }
 0xc61   : > { %v2063_v31 = vld [vmem:[#allocation4] sm:$0x3] }
 0xc62   : > { %v2067_v22 = vsel %vm2066_vm9, %v2063_v31, 0.0 }
 0xc63   : > { %2068 = vadd.xlane.f32.xlu0 %v2067_v22 }
 0xcf0   : > { %v2069_v32 = vpop.xlane.xlu0 %2068 }
 0xcf1   : > { %v2070_v61 = vmul.f32 0.03125, %v2069_v32 }
 0xcf3   : > { %v2071_v33 = vsub.f32 %v2063_v31, %v2070_v61 }
 0xcf5   : > { %v2072_v25 = vmul.f32 %v2071_v33, %v2071_v33 }
 0xcf7   : > { %v2073_v34 = vsel %vm2066_vm9, %v2072_v25, 0.0 }
 0xcf8   : > { %2074 = vadd.xlane.f32.xlu0 %v2073_v34 }
 0xd85   : > { %v2075_v40 = vpop.xlane.xlu0 %2074 }
 0xd86   : > { %v2076_v41 = vmul.f32 0.03125, %v2075_v40 }
 0xd88   : > { %v2077_v42 = vadd.f32 1e-05, %v2076_v41 }
 0xd8a   : > { %2844 = vrsqrt.f32 %v2077_v42 }
 0xd94   : > { %v2845_v43 = vpop.eup %2844 }
 0xd95   : > { %v2079_v37 = vmul.f32 %v2845_v43, %v2071_v33 }
 0xd97   : > { %v2086_v45 = vmul.f32 %v2533_v38, %v2079_v37 }
 0xd99   : > { %v2093_v46 = vadd.f32 %v2534_v44, %v2086_v45 }
 0xd9b   : > { %v2094_v47 = vpack.c.bf16 %v2093_v46, %v2093_v46 }
 0xd9d   : > { %2714 = vmatmul.mubr.msk.bf16.vlgmr.msra.gmra.mrb[0].mxu0 %vm1167_vm1, %v2094_v47 }
 0xe70   : > { %v2148_v49 = vpop.f32.mrb[0].mxu0 }
 0xe71   : > { %v2154_v51 = vpack.c.bf16 %v2148_v49, %v2148_v49  ;;  %v2715_v52 = vpop.f32.mrb[1].mxu0 }
 0xe72   : > { %v2151_v53 = vpop.f32.mrb[2].mxu0 }
 0xe73   : > { %v2716_v54 = vpop.f32.mrb[3].mxu0  ;;  %2720 = vmatmul.mubr.msk.bf16.vlgmr.msra.gmra.mrb[0].mxu1 %vm1283_vm3, %v2154_v51 }
 0xe74   : > { %2724 = vmatpush3.bf16.msra.mxu1 %v2842_v50  ;;  %2727 = vmatprep.mubr.msk.bf16.mxu1 %vm2910_vm10, %v2909_v36 }
 0xe75   : > { %2725 = vmatprep.subr.bf16.mxu1 %v2909_v36 }
 0xe78   : > { %2726 = vmatpush3.bf16.msra.mxu1 %v2843_v55 }
 0xf46   : > { %v2207_v57 = vpop.f32.mrb[0].mxu1 }
 0xf47   : > { %v2208_v58 = vadd.f32 %v2538_v56, %v2207_v57  ;;  %v2721_v59 = vpop.f32.mrb[1].mxu1 }
 0xf48   : > { %v2210_v62 = vpop.f32.mrb[2].mxu1 }
 0xf49   : > { %v2213_v63 = vmax.f32 %v2208_v58, 0.0  ;;  %v2722_v0 = vpop.f32.mrb[3].mxu1 }
 0xf4b   : > { %v2214_v1 = vpack.c.bf16 %v2213_v63, %v2213_v63 }
 0xf4d   : > { %2728 = vmatmul.mubr.msk.bf16.vlgmr.msra.gmra.mrb[4].mxu1 %vm1167_vm1, %v2214_v1 }
0x1020   : > { %v2275_v3 = vpop.f32.mrb[4].mxu1 }
0x1021   : > { %v2276_v4 = vadd.f32 %v2541_v2, %v2275_v3  ;;  %v2729_v5 = vpop.f32.mrb[5].mxu1 }
0x1022   : > { %v2278_v6 = vpop.f32.mrb[6].mxu1 }
0x1023   : > { %2282 = vst.msk [vmem:[#allocation5] sm:$0x3] %vm2281_vm11, %v2276_v4  ;;  %v2730_v7 = vpop.f32.mrb[7].mxu1 }
0x1024 PF: > { %s3519_s25 = sld [smem:[#allocation9_spill]]  ;;  %s2911_s26 = smov [#allocation5]  }
0x1025   : > { %s2292_s1 = sshll.u32 %s2911_s26, 4  ;;  %s2293_s1 = int_to_ptr.vmem [resolvable:$true] %s2292_s1 }
0x1026   : > { %s2846_s23 = scalar_lea.vmem %s2293_s1, 32  ;;  %p2853_p11 = scmp.lt.s32.totalorder %s2293_s1, %s2293_s1 }
0x1027   : > { %p2847_p8 = scmp.ne.s32.totalorder %s2293_s1, %s2846_s23  ;;  %p2854_p12 = scmp.lt.s32.totalorder %s2846_s23, %s2846_s23 }
0x1029   : > { %p2855_p13 = por %p2854_p12, %p2853_p11 }
0x102a   : > { %s3520_s8 = sadd.s32 4294967295, %s3519_s25  }
0x102b   : > { %p3411_p7 = scmp.eq.s32.totalorder %s3520_s8, 1 }
0x102d   : > { %p2848_p9 = pnand %p2847_p8, %p3411_p7 }
0x102f   : > { %p2849_p10 = pneg %p2848_p9 }
0x1031   : > { %p2856_p0 = pnand %p2855_p13, %p2849_p10 }
0x1033   : > { %2859 = shalt.err (!%p2856_p0)
}
0x1034   : > { %s3522_s22 = sld [smem:[#allocation25_spill]] }
0x103a   : > { %s2860_s6 = scalar_lea.hbm %s3522_s22, 32 }
0x103b   : > { %p2861_p1 = scmp.ne.s32.totalorder %s3522_s22, %s2860_s6  ;;  %p2866_p4 = scmp.lt.u32.totalorder %s2860_s6, %s3522_s22 }
0x103d   : > { %p2862_p2 = pnand %p2861_p1, %p3411_p7 }
0x103f   : > { %p2863_p3 = pneg %p2862_p2 }
0x1041   : > { %p2868_p5 = pnand %p2866_p4, %p2863_p3 }
0x1043   : > { %2871 = shalt.err (!%p2868_p5)
}
0x1044   : > { %2732 = dma.vmem_to_hbm [thread:$0]  (%p3411_p7), %s2293_s1, 32, %s3522_s22, [#allocation6]  }
0x1045   : > { %2885 = dma.done.wait (%p3411_p7), [#allocation6], 32  }
0x1046   : > { %2887 = vsyncadd (%p3411_p7), [#allocation6], 4294967264 }
0x1047 PF: > { %s3523_s7 = sld [smem:[#allocation9_spill]]  ;;  %s3524_s5 = sld [smem:[#allocation8_spill]] }
0x1048   : > { %s3525_s26 = sld [smem:[#allocation10_spill]] }
0x104d   : > { %s35_s27 = sadd.s32 1, %s3523_s7  }
0x104e   : > { %p32_p6 = scmp.ge.s32.totalorder %s35_s27, 4  }
0x1050   :  { %34 = sbr.rel (!%p32_p6) target bundleno = 18 (0x12), region = 188 }
0x1057   :  { %2305 = vsyncpa [#allocation6], 1 }
0x1058   :  { %2307 = vsyncpa [#allocation6 + $0x1], 1 }

</bundles_post_ra>
